<compile_context>
chip_gen: v7x
topology: tpu7x:2x2x1
jax: 0.10.0
libtpu: 0.0.40
codegen_flags: <defaults>
</compile_context>

<pallas_src>
import jax
import jax.numpy as jnp
from jax import lax
from jax.experimental import pallas as pl
from jax.experimental.pallas import tpu as pltpu


# ---------------------------------------------------------------------------
# Pallas kernel: fused UntiedConv + (Conv2d ++ gating conv) + sigmoid blend
# ---------------------------------------------------------------------------
def _myblock_kernel(unf_ref, wcat_ref, bcat_ref, wuc_ref, buc_ref, out_ref):
    o_ch = out_ref.shape[1]                      # O
    kp = unf_ref.shape[1]                        # padded patch length Kp

    unf = unf_ref[0]                             # (Kp, L) f32, L on lanes

    # --- pc1 + wl1 fused: single MXU matmul, bf16 in, f32 accumulation -----
    y = jnp.dot(wcat_ref[...],                   # (O+1, Kp) bf16
                unf.astype(jnp.bfloat16),        # (Kp, L)  bf16
                preferred_element_type=jnp.float32)          # (O+1, L)
    y = y + bcat_ref[...]                        # (O+1, 1) lane-broadcast bias
    x2 = y[:o_ch, :]                             # (O, L)  shared conv
    gate = y[o_ch:o_ch + 1, :]                   # (1, L)  gating logits
    s = pl.reciprocal(1.0 + jnp.exp(-gate), approx=True)     # sigmoid (EUP)

    # --- uc1: untied (locally-connected) conv ------------------------------
    # wuc is (O, Kp, L): per-lane (per spatial position) weights.  Reduce over
    # the sublane (K) axis in 8-row chunks so live temporaries stay small
    # (each chunk temp is only (O, 8, L)); static slices are zero-cost views.
    x1 = buc_ref[...]                            # (O, L) start from bias
    kch = 8
    for c in range(kp // kch):
        u = unf[c * kch:(c + 1) * kch, :]        # (8, L)
        w = wuc_ref[:, c * kch:(c + 1) * kch, :] # (O, 8, L)
        x1 = x1 + jnp.sum(u[None, :, :] * w, axis=1)

    # --- gated blend: x1 * sigma + x2 * (1 - sigma) -------------------------
    out_ref[0] = x1 * s + x2 * (1.0 - s)


# ---------------------------------------------------------------------------
# JAX glue
# ---------------------------------------------------------------------------
def im2col(x, kh, kw, stride, padding):
    """PyTorch nn.Unfold ordering: j = c*kh*kw + ki*kw + kj. Returns (N,L,K)."""
    N, C, H, W = x.shape
    xp = jnp.pad(x, ((0, 0), (0, 0), (padding, padding), (padding, padding)))
    Ho = (H + 2 * padding - kh) // stride + 1
    Wo = (W + 2 * padding - kw) // stride + 1
    cols = []
    for ki in range(kh):
        for kj in range(kw):
            cols.append(xp[:, :, ki:ki + stride * Ho:stride,
                              kj:kj + stride * Wo:stride])   # (N,C,Ho,Wo)
    col = jnp.stack(cols, axis=0).reshape(kh, kw, N, C, Ho, Wo)
    col = col.transpose(2, 4, 5, 3, 0, 1)                    # (N,Ho,Wo,C,kh,kw)
    return col.reshape(N, Ho * Wo, C * kh * kw)


def init_params(key, input_shape, in_ch, out_ch, ksz, kernel_num, pad, stride):
    C, H, W = input_shape
    kh, kw = ksz
    Ho = (H + 2 * pad - kh) // stride + 1
    Wo = (W + 2 * pad - kw) // stride + 1
    # The PyTorch module's UntiedConv broadcast is only valid in this regime.
    assert kernel_num == Ho * Wo, "MyBlock requires kernel_num == out_h*out_w"
    L, K = Ho * Wo, in_ch * kh * kw
    ks = jax.random.split(key, 6)
    # Deterministic synthetic init (module uses xavier; scale is irrelevant).
    return {
        "w_uc_flat": 0.1 * jax.random.normal(ks[0], (K * L, out_ch), jnp.float32),
        "b_uc": 0.1 * jax.random.normal(ks[1], (1, out_ch, Ho, Wo), jnp.float32),
        "w_pc": 0.1 * jax.random.normal(ks[2], (out_ch, in_ch, kh, kw), jnp.float32),
        "b_pc": 0.1 * jax.random.normal(ks[3], (out_ch,), jnp.float32),
        "w_wl": 0.1 * jax.random.normal(ks[4], (1, in_ch, kh, kw), jnp.float32),
        "b_wl": 0.1 * jax.random.normal(ks[5], (1,), jnp.float32),
    }


def myblock_forward(x, p, kernel_size, stride=1, padding=0):
    N, C, H, W = x.shape
    kh, kw = kernel_size
    Ho = (H + 2 * padding - kh) // stride + 1
    Wo = (W + 2 * padding - kw) // stride + 1
    L, K = Ho * Wo, C * kh * kw
    O = p["w_pc"].shape[0]
    assert p["w_uc_flat"].shape[0] == K * L, (
        "UntiedConv broadcast requires kernel_num == out_h*out_w")

    Kp = ((K + 7) // 8) * 8                      # sublane-aligned patch length
    pad_k = Kp - K

    # --- glue: im2col + parameter re-layout (pure reshapes / transposes) ---
    unf = im2col(x, kh, kw, stride, padding)                      # (N, L, K)
    unf_t = jnp.pad(unf.transpose(0, 2, 1),
                    ((0, 0), (0, pad_k), (0, 0)))                 # (N, Kp, L)

    # untied weights: (K*L, O) -> (O, Kp, L);  untied bias: (1,O,Ho,Wo)->(O,L)
    w_uc = p["w_uc_flat"].reshape(L, K, O).transpose(2, 1, 0)     # (O, K, L)
    w_uc = jnp.pad(w_uc, ((0, 0), (0, pad_k), (0, 0)))            # (O, Kp, L)
    b_uc = p["b_uc"][0].reshape(O, L)                             # (O, L)

    # fuse pc1 + wl1: one (O+1, Kp) bf16 weight and one (O+1, 1) f32 bias
    w_cat = jnp.concatenate([p["w_pc"].reshape(O, K),
                             p["w_wl"].reshape(1, K)], axis=0)    # (O+1, K)
    w_cat = jnp.pad(w_cat, ((0, 0), (0, pad_k))).astype(jnp.bfloat16)
    b_cat = jnp.concatenate([p["b_pc"], p["b_wl"]]).reshape(O + 1, 1)

    out = pl.pallas_call(
        _myblock_kernel,
        out_shape=jax.ShapeDtypeStruct((N, O, L), jnp.float32),
        grid_spec=pltpu.PrefetchScalarGridSpec(
            num_scalar_prefetch=0,
            grid=(N,),
            in_specs=[
                pl.BlockSpec((1, Kp, L),  lambda n: (n, 0, 0)),   # patches
                pl.BlockSpec((O + 1, Kp), lambda n: (0, 0)),      # fused W (bf16)
                pl.BlockSpec((O + 1, 1),  lambda n: (0, 0)),      # fused bias
                pl.BlockSpec((O, Kp, L),  lambda n: (0, 0, 0)),   # untied W
                pl.BlockSpec((O, L),      lambda n: (0, 0)),      # untied bias
            ],
            out_specs=pl.BlockSpec((1, O, L), lambda n: (n, 0, 0)),
        ),
        compiler_params=pltpu.CompilerParams(
            dimension_semantics=("parallel",),
            vmem_limit_bytes=32 * 1024 * 1024),
    )(unf_t, w_cat, b_cat, w_uc, b_uc)

    # (N, O, L) is already flat NCHW: just reshape, no transpose needed.
    return out.reshape(N, O, Ho, Wo)


def reference_forward(x, p, kernel_size, stride=1, padding=0):
    """Pure-JAX f32 reference mirroring the PyTorch MyBlock.forward."""
    N, C, H, W = x.shape
    kh, kw = kernel_size
    O = p["w_pc"].shape[0]
    Ho = (H + 2 * padding - kh) // stride + 1
    Wo = (W + 2 * padding - kw) // stride + 1
    L, K = Ho * Wo, C * kh * kw
    dn = ("NCHW", "OIHW", "NCHW")
    pad2 = [(padding, padding), (padding, padding)]

    x2 = lax.conv_general_dilated(x, p["w_pc"], (stride, stride), pad2,
                                  dimension_numbers=dn) + p["b_pc"].reshape(1, O, 1, 1)
    g = lax.conv_general_dilated(x, p["w_wl"], (stride, stride), pad2,
                                 dimension_numbers=dn) + p["b_wl"].reshape(1, 1, 1, 1)
    x3 = jax.nn.sigmoid(g)

    unf = im2col(x, kh, kw, stride, padding)                     # (N, L, K)
    w_uc = p["w_uc_flat"].reshape(L, K, O)
    x1 = jnp.einsum("nlk,lko->nlo", unf, w_uc)
    x1 = x1.reshape(N, Ho, Wo, O).transpose(0, 3, 1, 2) + p["b_uc"]
    return x1 * x3 + x2 * (1.0 - x3)


if __name__ == "__main__":
    # Shapes consistent with the module (kernel_num must equal out_h*out_w).
    N, C, H, W = 2, 4, 16, 16
    out_ch = 8
    ksz, pad, stride = (3, 3), 0, 1
    Ho = (H + 2 * pad - ksz[0]) // stride + 1
    Wo = (W + 2 * pad - ksz[1]) // stride + 1
    kernel_num = Ho * Wo  # = 196

    key = jax.random.PRNGKey(0)
    kx, kparam = jax.random.split(key)
    x = jax.random.normal(kx, (N, C, H, W), jnp.float32)
    params = init_params(kparam, (C, H, W), C, out_ch, ksz, kernel_num, pad, stride)

    y = myblock_forward(x, params, ksz, stride, pad)
    y = jax.block_until_ready(y)
    assert y.shape == (N, out_ch, Ho, Wo), y.shape

    y_ref = reference_forward(x, params, ksz, stride, pad)
    err = float(jnp.max(jnp.abs(y - y_ref)))
    # bf16 MXU operands + approximate-reciprocal sigmoid vs f32 reference.
    assert err < 6e-2, f"max abs error too large: {err}"

    print("KERNEL_OK")
</pallas_src>

<mosaic_0001>
module attributes {stable_mosaic.version = 11 : i64} {
  func.func @_myblock_kernel(%arg0: i32, %arg1: memref<1x40x196xf32, #tpu.memory_space<vmem>>, %arg2: memref<9x40xbf16, #tpu.memory_space<vmem>>, %arg3: memref<9x1xf32, #tpu.memory_space<vmem>>, %arg4: memref<8x40x196xf32, #tpu.memory_space<vmem>>, %arg5: memref<8x196xf32, #tpu.memory_space<vmem>>, %arg6: memref<1x8x196xf32, #tpu.memory_space<vmem>>) attributes {dimension_semantics = [#tpu.dimension_semantics<parallel>], iteration_bounds = array<i64: 2>, scalar_prefetch = 0 : i64, scratch_operands = 0 : i64, tpu.core_type = #tpu.core_type<tc>, window_params = [{transform_indices = @transform_0, window_bounds = array<i64: 1, 40, 196>}, {pipeline_mode = #tpu.pipeline_mode<synchronous>, transform_indices = @transform_1, window_bounds = array<i64: 9, 40>}, {pipeline_mode = #tpu.pipeline_mode<synchronous>, transform_indices = @transform_2, window_bounds = array<i64: 9, 1>}, {pipeline_mode = #tpu.pipeline_mode<synchronous>, transform_indices = @transform_3, window_bounds = array<i64: 8, 40, 196>}, {pipeline_mode = #tpu.pipeline_mode<synchronous>, transform_indices = @transform_4, window_bounds = array<i64: 8, 196>}, {transform_indices = @transform_5, window_bounds = array<i64: 1, 8, 196>}]} {
    %c0 = arith.constant 0 : index
    %c0_0 = arith.constant 0 : index
    %c0_1 = arith.constant 0 : index
    %0 = vector.load %arg1[%c0, %c0_0, %c0_1] : memref<1x40x196xf32, #tpu.memory_space<vmem>>, vector<1x40x196xf32>
    %1 = vector.shape_cast %0 : vector<1x40x196xf32> to vector<40x196xf32>
    %c0_2 = arith.constant 0 : index
    %c0_3 = arith.constant 0 : index
    %2 = vector.load %arg2[%c0_2, %c0_3] : memref<9x40xbf16, #tpu.memory_space<vmem>>, vector<9x40xbf16>
    %3 = arith.truncf %1 : vector<40x196xf32> to vector<40x196xbf16>
    %cst = arith.constant dense<0.000000e+00> : vector<9x196xf32>
    %4 = tpu.matmul %2, %3, %cst {dimension_numbers = #tpu.dot_dimension_numbers<[1], [0], [0], [1], [0, 0, 1, 1], [], []>} : vector<9x40xbf16>, vector<40x196xbf16>, vector<9x196xf32> -> vector<9x196xf32>
    %c0_4 = arith.constant 0 : index
    %c0_5 = arith.constant 0 : index
    %5 = vector.load %arg3[%c0_4, %c0_5] : memref<9x1xf32, #tpu.memory_space<vmem>>, vector<9x1xf32>
    %6 = vector.broadcast %5 : vector<9x1xf32> to vector<9x196xf32>
    %7 = arith.addf %4, %6 : vector<9x196xf32>
    %8 = vector.extract_strided_slice %7 {offsets = [0, 0], sizes = [8, 196], strides = [1, 1]} : vector<9x196xf32> to vector<8x196xf32>
    %9 = vector.extract_strided_slice %7 {offsets = [8, 0], sizes = [1, 196], strides = [1, 1]} : vector<9x196xf32> to vector<1x196xf32>
    %cst_6 = arith.constant 0.000000e+00 : f32
    %10 = vector.broadcast %cst_6 : f32 to vector<1x196xf32>
    %11 = arith.subf %10, %9 : vector<1x196xf32>
    %12 = math.exp %11 : vector<1x196xf32>
    %cst_7 = arith.constant 1.000000e+00 : f32
    %13 = vector.broadcast %cst_7 : f32 to vector<1x196xf32>
    %14 = arith.addf %13, %12 : vector<1x196xf32>
    %15 = tpu.reciprocal %14 {approx = true} : vector<1x196xf32> -> vector<1x196xf32>
    %c0_8 = arith.constant 0 : index
    %c0_9 = arith.constant 0 : index
    %16 = vector.load %arg5[%c0_8, %c0_9] : memref<8x196xf32, #tpu.memory_space<vmem>>, vector<8x196xf32>
    %17 = vector.extract_strided_slice %1 {offsets = [0, 0], sizes = [8, 196], strides = [1, 1]} : vector<40x196xf32> to vector<8x196xf32>
    %c0_10 = arith.constant 0 : index
    %c0_11 = arith.constant 0 : index
    %c0_12 = arith.constant 0 : index
    %18 = vector.load %arg4[%c0_10, %c0_11, %c0_12] : memref<8x40x196xf32, #tpu.memory_space<vmem>>, vector<8x8x196xf32>
    %19 = vector.shape_cast %17 : vector<8x196xf32> to vector<1x8x196xf32>
    %20 = vector.broadcast %19 : vector<1x8x196xf32> to vector<8x8x196xf32>
    %21 = arith.mulf %20, %18 : vector<8x8x196xf32>
    %cst_13 = arith.constant dense<0.000000e+00> : vector<8x196xf32>
    %22 = vector.multi_reduction <add>, %21, %cst_13 [1] : vector<8x8x196xf32> to vector<8x196xf32>
    %23 = arith.addf %16, %22 : vector<8x196xf32>
    %24 = vector.extract_strided_slice %1 {offsets = [8, 0], sizes = [8, 196], strides = [1, 1]} : vector<40x196xf32> to vector<8x196xf32>
    %c0_14 = arith.constant 0 : index
    %c8 = arith.constant 8 : index
    %c0_15 = arith.constant 0 : index
    %25 = vector.load %arg4[%c0_14, %c8, %c0_15] : memref<8x40x196xf32, #tpu.memory_space<vmem>>, vector<8x8x196xf32>
    %26 = vector.shape_cast %24 : vector<8x196xf32> to vector<1x8x196xf32>
    %27 = vector.broadcast %26 : vector<1x8x196xf32> to vector<8x8x196xf32>
    %28 = arith.mulf %27, %25 : vector<8x8x196xf32>
    %cst_16 = arith.constant dense<0.000000e+00> : vector<8x196xf32>
    %29 = vector.multi_reduction <add>, %28, %cst_16 [1] : vector<8x8x196xf32> to vector<8x196xf32>
    %30 = arith.addf %23, %29 : vector<8x196xf32>
    %31 = vector.extract_strided_slice %1 {offsets = [16, 0], sizes = [8, 196], strides = [1, 1]} : vector<40x196xf32> to vector<8x196xf32>
    %c0_17 = arith.constant 0 : index
    %c16 = arith.constant 16 : index
    %c0_18 = arith.constant 0 : index
    %32 = vector.load %arg4[%c0_17, %c16, %c0_18] : memref<8x40x196xf32, #tpu.memory_space<vmem>>, vector<8x8x196xf32>
    %33 = vector.shape_cast %31 : vector<8x196xf32> to vector<1x8x196xf32>
    %34 = vector.broadcast %33 : vector<1x8x196xf32> to vector<8x8x196xf32>
    %35 = arith.mulf %34, %32 : vector<8x8x196xf32>
    %cst_19 = arith.constant dense<0.000000e+00> : vector<8x196xf32>
    %36 = vector.multi_reduction <add>, %35, %cst_19 [1] : vector<8x8x196xf32> to vector<8x196xf32>
    %37 = arith.addf %30, %36 : vector<8x196xf32>
    %38 = vector.extract_strided_slice %1 {offsets = [24, 0], sizes = [8, 196], strides = [1, 1]} : vector<40x196xf32> to vector<8x196xf32>
    %c0_20 = arith.constant 0 : index
    %c24 = arith.constant 24 : index
    %c0_21 = arith.constant 0 : index
    %39 = vector.load %arg4[%c0_20, %c24, %c0_21] : memref<8x40x196xf32, #tpu.memory_space<vmem>>, vector<8x8x196xf32>
    %40 = vector.shape_cast %38 : vector<8x196xf32> to vector<1x8x196xf32>
    %41 = vector.broadcast %40 : vector<1x8x196xf32> to vector<8x8x196xf32>
    %42 = arith.mulf %41, %39 : vector<8x8x196xf32>
    %cst_22 = arith.constant dense<0.000000e+00> : vector<8x196xf32>
    %43 = vector.multi_reduction <add>, %42, %cst_22 [1] : vector<8x8x196xf32> to vector<8x196xf32>
    %44 = arith.addf %37, %43 : vector<8x196xf32>
    %45 = vector.extract_strided_slice %1 {offsets = [32, 0], sizes = [8, 196], strides = [1, 1]} : vector<40x196xf32> to vector<8x196xf32>
    %c0_23 = arith.constant 0 : index
    %c32 = arith.constant 32 : index
    %c0_24 = arith.constant 0 : index
    %46 = vector.load %arg4[%c0_23, %c32, %c0_24] : memref<8x40x196xf32, #tpu.memory_space<vmem>>, vector<8x8x196xf32>
    %47 = vector.shape_cast %45 : vector<8x196xf32> to vector<1x8x196xf32>
    %48 = vector.broadcast %47 : vector<1x8x196xf32> to vector<8x8x196xf32>
    %49 = arith.mulf %48, %46 : vector<8x8x196xf32>
    %cst_25 = arith.constant dense<0.000000e+00> : vector<8x196xf32>
    %50 = vector.multi_reduction <add>, %49, %cst_25 [1] : vector<8x8x196xf32> to vector<8x196xf32>
    %51 = arith.addf %44, %50 : vector<8x196xf32>
    %52 = vector.broadcast %15 : vector<1x196xf32> to vector<8x196xf32>
    %53 = arith.mulf %51, %52 : vector<8x196xf32>
    %cst_26 = arith.constant 1.000000e+00 : f32
    %54 = vector.broadcast %cst_26 : f32 to vector<1x196xf32>
    %55 = arith.subf %54, %15 : vector<1x196xf32>
    %56 = vector.broadcast %55 : vector<1x196xf32> to vector<8x196xf32>
    %57 = arith.mulf %8, %56 : vector<8x196xf32>
    %58 = arith.addf %53, %57 : vector<8x196xf32>
    %c0_27 = arith.constant 0 : index
    %c0_28 = arith.constant 0 : index
    %c0_29 = arith.constant 0 : index
    %59 = vector.load %arg6[%c0_27, %c0_28, %c0_29] : memref<1x8x196xf32, #tpu.memory_space<vmem>>, vector<1x8x196xf32>
    %60 = vector.shape_cast %59 : vector<1x8x196xf32> to vector<8x196xf32>
    %61 = vector.shape_cast %58 : vector<8x196xf32> to vector<1x8x196xf32>
    tpu.vector_store %arg6[%c0_27, %c0_28, %c0_29], %61 {strides = array<i32>} : memref<1x8x196xf32, #tpu.memory_space<vmem>>, vector<1x8x196xf32>,
    return
  }
  func.func @transform_0(%arg0: i32) -> (i32, i32, i32) {
    %c0_i32 = arith.constant 0 : i32
    %c0_i32_0 = arith.constant 0 : i32
    %c0_i32_1 = arith.constant 0 : i32
    return %arg0, %c0_i32, %c0_i32_0 : i32, i32, i32
  }
  func.func @transform_1(%arg0: i32) -> (i32, i32) {
    %c0_i32 = arith.constant 0 : i32
    %c0_i32_0 = arith.constant 0 : i32
    %c0_i32_1 = arith.constant 0 : i32
    return %c0_i32, %c0_i32_0 : i32, i32
  }
  func.func @transform_2(%arg0: i32) -> (i32, i32) {
    %c0_i32 = arith.constant 0 : i32
    %c0_i32_0 = arith.constant 0 : i32
    %c0_i32_1 = arith.constant 0 : i32
    return %c0_i32, %c0_i32_0 : i32, i32
  }
  func.func @transform_3(%arg0: i32) -> (i32, i32, i32) {
    %c0_i32 = arith.constant 0 : i32
    %c0_i32_0 = arith.constant 0 : i32
    %c0_i32_1 = arith.constant 0 : i32
    %c0_i32_2 = arith.constant 0 : i32
    return %c0_i32, %c0_i32_0, %c0_i32_1 : i32, i32, i32
  }
  func.func @transform_4(%arg0: i32) -> (i32, i32) {
    %c0_i32 = arith.constant 0 : i32
    %c0_i32_0 = arith.constant 0 : i32
    %c0_i32_1 = arith.constant 0 : i32
    return %c0_i32, %c0_i32_0 : i32, i32
  }
  func.func @transform_5(%arg0: i32) -> (i32, i32, i32) {
    %c0_i32 = arith.constant 0 : i32
    %c0_i32_0 = arith.constant 0 : i32
    %c0_i32_1 = arith.constant 0 : i32
    return %arg0, %c0_i32, %c0_i32_0 : i32, i32, i32
  }
}

</mosaic_0001>

<bundles_post_ra>
// kernel: tpu_custom_call.1
= control target key start
LH: loop header
LB: loop body
LE: loop exit
PB: predicated region body
PF: predicated region fallthrough
CT: control target
= control target key end

     0   :  { %10 = vsyncpa [#allocation3], 0  ;;  %s2279_s0 = inlined_call_operand.hbm [shape: f32[2,40,196], index: 0, kind: input, shape index: {}]   ;;  %s2280_s1 = inlined_call_operand.vmem [shape: bf16[9,40], index: 1, kind: input, shape index: {}]   ;;  %s2281_s2 = inlined_call_operand.vmem [shape: f32[9,1], index: 2, kind: input, shape index: {}]   ;;  %s2282_s3 = inlined_call_operand.hbm [shape: f32[8,40,196], index: 3, kind: input, shape index: {}]   ;;  %s2283_s4 = inlined_call_operand.vmem [shape: f32[8,196], index: 4, kind: input, shape index: {}]   ;;  %s2284_s5 = inlined_call_operand.hbm [shape: f32[2,8,196], index: 5, kind: output, shape index: {}]  }
   0x1   :  { %12 = vsyncpa [#allocation3 + $0x1], 0 }
   0x2   :  { %13 = vsyncpa [#allocation6], 0 }
   0x3   :  { %14 = vsyncpa [#allocation4], 0 }
   0x4   :  { %16 = vsyncpa [#allocation4 + $0x1], 0  ;;  %s1599_s18 = smov 0   ;;  %s1601_s19 = smov 0  }
   0x5   :  { %s1603_s20 = smov 0   ;;  %s1605_s21 = smov 0  }
   0x6 LB: > { %s1620_s22 = sadd.s32 4294967295, %s1561_s21   ;;  %s1339_s23 = sadd.s32 4294967294, %s1561_s21   ;;  %s1561_s21 = sphi %s1605_s21, %s2312_s21   ;;  %s1557_s20 = sphi %s1603_s20, %s2311_s20   ;;  %s1553_s19 = sphi %s1601_s19, %s2310_s19   ;;  %s1549_s18 = sphi %s1599_s18, %s2309_s18  }
   0x7   : > { %p42_p0 = scmp.ne.s32.totalorder %s1553_s19, %s1549_s18  ;;  %p2285_p1 = scmp.eq.s32.totalorder %s1620_s22, 0 }
   0x8   : > { %p156_p3 = scmp.eq.s32.totalorder %s1339_s23, 1  ;;  %p1340_p5 = scmp.ge.s32.totalorder %s1561_s21, 1 }
   0x9   : > { %p1629_p4 = por %p2285_p1, %p42_p0  ;;  %p163_p7 = scmp.lt.s32.totalorder %s1561_s21, 3 }
   0xa   : > { %p1634_p6 = por %p156_p3, %p42_p0  ;;  %s1563_s27 = smov [#allocation5]  }
   0xb   : > { %s2289_s24 = scalar_select %p1629_p4, 1, 0 }
   0xc   : > { %s2290_s25 = scalar_select %p1634_p6, 1, 0 }
   0xd   : > { %p1639_p8 = pnand %p1340_p5, %p163_p7  ;;  %s181_s28 = sshll.u32 %s1563_s27, 4  ;;  %s1643_s28 = int_to_ptr.vmem [resolvable:$true] %s181_s28 }
   0xe   : > { %s1655_s30 = sadd.s32 1, %s1561_s21   ;;  %s29_s6 = sadd.s32 1, %s1557_s20 }
   0xf   : > { %s2291_s26 = scalar_select %p1639_p8, 1, 0 }
  0x10   : > { %p1367_p9 = pneg %p1639_p8  ;;  %s26_s7 = ssub.s32 %s1561_s21, %s1655_s30 }
  0x11   : > { %s1433_s10 = scalar_lea.hbm %s2282_s3, 10240 }
  0x12   : > { %p1650_p11 = pnand %p1367_p9, %p2285_p1  ;;  %p1434_p12 = scmp.ne.s32.totalorder %s2282_s3, %s1433_s10 }
  0x13   : > { %p1440_p5 = scmp.lt.u32.totalorder %s1433_s10, %s2282_s3 }
  0x14   : > { %p1435_p13 = pneg %p1650_p11 }
  0x16   : > { %p1436_p0 = pnand %p1435_p13, %p1434_p12 }
  0x18   : > { %p1437_p3 = pneg %p1436_p0 }
  0x1a   : > { %p1442_p7 = pnand %p1440_p5, %p1437_p3 }
  0x1c   : > { %1445 = shalt.err (!%p1442_p7)
}
  0x1d   : > { %s1446_s15 = scalar_lea.vmem %s1643_s28, 10240  ;;  %p1454_p2 = scmp.lt.s32.totalorder %s1643_s28, %s1643_s28 }
  0x1e   : > { %p1447_p9 = scmp.ne.s32.totalorder %s1643_s28, %s1446_s15  ;;  %p1455_p6 = scmp.lt.s32.totalorder %s1446_s15, %s1446_s15 }
  0x20   : > { %p1449_p10 = pnand %p1447_p9, %p1435_p13  ;;  %p1456_p4 = por %p1455_p6, %p1454_p2 }
  0x22   : > { %p1450_p1 = pneg %p1449_p10 }
  0x24   : > { %p1457_p8 = pnand %p1456_p4, %p1450_p1 }
  0x26   : > { %1460 = shalt.err (!%p1457_p8)
}
  0x27   : > { %s2288_s16 = smov 256   ;;  %s1565_s17 = smov 16  }
  0x28   : > { %1370 = dma.hbm_to_vmem [thread:$0]  (!%p1650_p11), %s2282_s3, 10240, %s1643_s28, [#allocation6], %s2288_s16, %s2288_s16, %s1565_s17  }
  0x29   : > { %p27_p1 = scmp.eq.s32.totalorder %s26_s7, 0  ;;  %p36_p2 = scmp.ne.s32.totalorder %s1557_s20, %s1553_s19 }
  0x2a   : > { %p37_p4 = scmp.eq.s32.totalorder %s1561_s21, 0  ;;  %p1380_p6 = scmp.lt.s32.totalorder %s1561_s21, 2 }
  0x2b   : > { %s1689_s8 = scalar_select %p27_p1, %s1557_s20, %s29_s6  }
  0x2c   : > { %p38_p8 = por %p37_p4, %p36_p2  ;;  %p2293_p10 = scmp.eq.s32.totalorder %s1620_s22, 1 }
  0x2d   : > { %s198_s29 = sand.u32 1, %s1557_s20   ;;  %s1357_s10 = smul.u32 1280, %s1561_s21 }
  0x2e   : > { %p1693_p12 = por %p2293_p10, %p36_p2  ;;  %s1356_s11 = smul.u32 80, %s198_s29 }
  0x2f   : > { %p1699_p13 = pnand %p1380_p6, %p38_p8  ;;  %s1706_s6 = scalar_lea.hbm %s2279_s0, %s1357_s10 }
  0x30   : > { %s202_s13 = scalar_lea.vmem [#allocation2], %s1356_s11  ;;  %s1710_s15 = scalar_lea.sflag [#allocation3], %s198_s29 }
  0x31   : > { %s209_s14 = sshll.u32 %s202_s13, 4  ;;  %s1461_s23 = scalar_lea.hbm %s1706_s6, 1280  ;;  %s1708_s14 = int_to_ptr.vmem [resolvable:$true] %s209_s14 }
  0x32   : > { %p1462_p11 = scmp.ne.s32.totalorder %s1706_s6, %s1461_s23  ;;  %p1463_p0 = pneg %p1699_p13 }
  0x33   : > { %s1466_s28 = scalar_lea.hbm %s2279_s0, 2560  ;;  %p1467_p7 = scmp.lt.u32.totalorder %s1706_s6, %s2279_s0 }
  0x34   : > { %p1464_p3 = pnand %p1463_p0, %p1462_p11  ;;  %p1468_p9 = scmp.lt.u32.totalorder %s1466_s28, %s1461_s23 }
  0x35   : > { %p1470_p2 = scmp.lt.u32.totalorder %s1461_s23, %s1706_s6 }
  0x36   : > { %p1465_p5 = pneg %p1464_p3  ;;  %p1469_p1 = por %p1468_p9, %p1467_p7 }
  0x38   : > { %p1471_p4 = por %p1470_p2, %p1469_p1 }
  0x3a   : > { %p1472_p6 = pnand %p1471_p4, %p1465_p5 }
  0x3c   : > { %1475 = shalt.err (!%p1472_p6)
}
  0x3d   : > { %s1476_s29 = scalar_lea.vmem %s1708_s14, 1280  ;;  %s1566_s11 = smov [#allocation2]  }
  0x3e   : > { %p1477_p8 = scmp.ne.s32.totalorder %s1708_s14, %s1476_s29  ;;  %s1481_s13 = sshll.u32 %s1566_s11, 4  ;;  %s1482_s13 = int_to_ptr.vmem [resolvable:$false] %s1481_s13 }
  0x3f   : > { %s1483_s16 = scalar_lea.vmem %s1482_s13, 2560  ;;  %p1484_p3 = scmp.lt.s32.totalorder %s1708_s14, %s1482_s13 }
  0x40   : > { %p1479_p10 = pnand %p1477_p8, %p1463_p0  ;;  %p1485_p7 = scmp.lt.s32.totalorder %s1483_s16, %s1476_s29 }
  0x42   : > { %p1480_p11 = pneg %p1479_p10  ;;  %p1486_p9 = por %p1485_p7, %p1484_p3 }
  0x44   : > { %p1487_p1 = pnand %p1486_p9, %p1480_p11 }
  0x46   : > { %1490 = shalt.err (!%p1487_p1)
}
  0x47   : > { %s2296_s23 = smov 256   ;;  %p2297_p0 = scmp.ne.s32.totalorder %s2291_s26, 0 }
  0x48   : > { %1374 = dma.hbm_to_vmem [thread:$0]  (!%p1699_p13), %s1706_s6, 1280, %s1708_s14, %s1710_s15, %s2296_s23, %s2296_s23, %s1565_s17  }
  0x49   : > { %221 = sbr.rel (%p2297_p0) target bundleno = 366 (0x16e), region = 40  ;;  %s1744_s27 = sand.u32 (!%p2297_p0), 1, %s1553_s19  }
  0x4a   : > { %s1358_s10 = smul.u32 (!%p2297_p0), 80, %s1744_s27  ;;  %s224_s28 = scalar_lea.sflag (!%p2297_p0), [#allocation3], %s1744_s27 }
  0x4b   : > { %p2298_p5 = scmp.ne.s32.totalorder (!%p2297_p0), %s2289_s24, 0 }
  0x4c   : > { %s1748_s7 = scalar_lea.vmem (!%p2297_p0), [#allocation2], %s1358_s10 }
  0x50   : > { %1536 = dma.done.wait (%p2298_p5), %s224_s28, 1280  }
  0x51   : > { %1538 = vsyncadd (%p2298_p5), %s224_s28, 4294966016  ;;  %p2299_p13 = scmp.eq.s32.totalorder %s1620_s22, 0 }
  0x53   : > { %1540 = dma.done.wait (%p2299_p13), [#allocation6], 10240   ;;  %p2300_p2 = pmov %p2299_p13 }
  0x54   : > { %v1567_v0 = vmov 0   ;;  %v1759_v1 = vld [vmem:[%s1748_s7 + $0x8] sm:$0xff]  ;;  %v1762_v2 = vld [vmem:[%s1748_s7 + $0x18] sm:$0xff]  ;;  %v1767_v4 = vld [vmem:[%s1748_s7] sm:$0xff]  ;;  %vm298_vm0 = vcmask 1043456   ;;  %vm294_vm1 = vcmask 326656  }
  0x55   : > { %1542 = vsyncadd (%p2300_p2), [#allocation6], 4294957056  ;;  %337 = vmatprep.mubr.bf16.mxu0 %v1567_v0  ;;  %1419 = vset.pattern.permute.xlu0 %v1567_v0  ;;  %v272_v3 = vpack.c.bf16 %v1762_v2, %v1759_v1  ;;  %v1770_v5 = vld [vmem:[%s1748_s7 + $0x10] sm:$0xff]  ;;  %v278_v7 = vld [vmem:[%s2281_s2 + $0x8] sm:$0x1]  ;;  %vm398_vm2 = vcmask 556032  }
  0x56   : > { %v271_v6 = vpack.c.bf16 %v1770_v5, %v1767_v4  ;;  %286 = vperm.xlu0 %1419, %v278_v7   ;;  %v1778_v8 = vld [vmem:[%s1748_s7 + $0x28] sm:$0xff]  ;;  %v1781_v9 = vld [vmem:[%s1748_s7 + $0x38] sm:$0xff]  ;;  %v277_v10 = vld [vmem:[%s2281_s2] sm:$0xff]  ;;  %vm513_vm3 = vcmask 1041409   ;;  %vm515_vm4 = vcmask 1042434   ;;  %vm517_vm5 = vcmask 1043459  }
  0x57   : > { %305 = vmatprep.subr.bf16.mxu0 %v272_v3  ;;  %v274_v11 = vpack.c.bf16 %v1781_v9, %v1778_v8  ;;  %v1789_v12 = vld [vmem:[%s1748_s7 + $0x20] sm:$0xff]  ;;  %v265_v13 = vld [vmem:[%s1748_s7 + $0x30] sm:$0xff]  ;;  %v1793_v14 = vld [vmem:[%s1748_s7 + $0x48] sm:$0xff]  ;;  %vm519_vm6 = vcmask 1044484   ;;  %vm521_vm7 = vcmask 1045509   ;;  %vm523_vm8 = vcmask 1046534  }
  0x58   : > { %306 = vmatpush1.bf16.msra.mxu0 %v271_v6  ;;  %v267_v15 = vld [vmem:[%s1748_s7 + $0x40] sm:$0xff]  ;;  %v273_v16 = vpack.c.bf16 %v265_v13, %v1789_v12  ;;  %v276_v17 = vpack.c.bf16 %v1793_v14, %v1793_v14  ;;  %v361_v21 = vld [vmem:[#allocation5 + $0x8] sm:$0xff]  ;;  %v363_v22 = vld [vmem:[#allocation5 + $0x58] sm:$0xff]  ;;  %vm525_vm9 = vcmask 1047559   ;;  %s1346_s16 = sshll.u32 %s1744_s27, 4  ;;  %s1355_s23 = sshll.u32 %s1620_s22, 8 }
  0x59   : > { %307 = vmatprep.subr.bf16.mxu0 %v274_v11  ;;  %v275_v18 = vpack.c.bf16 %v267_v15, %v267_v15  ;;  %v1420_v20 = vld [vmem:[%s2280_s1] sm:$0x1f]   ;;  %v365_v23 = vld [vmem:[#allocation5 + $0xa8] sm:$0xff]  ;;  %v377_v24 = vmul.f32 %v361_v21, %v1759_v1  ;;  %v367_v25 = vld [vmem:[#allocation5 + $0xf8] sm:$0xff]  ;;  %v379_v26 = vmul.f32 %v363_v22, %v1759_v1  ;;  %s257_s10 = scalar_lea.vmem [#allocation7], %s1346_s16  ;;  %s2235_s26 = scalar_lea.hbm %s2284_s5, %s1355_s23 }
  0x5a   : > { %281 = vperm.xlu0 %1419, %v277_v10   ;;  %v381_v27 = vmul.f32 %v365_v23, %v1759_v1  ;;  %v369_v28 = vld [vmem:[#allocation5 + $0x148] sm:$0xff]  ;;  %v383_v29 = vmul.f32 %v367_v25, %v1759_v1  ;;  %v539_v33 = vld [vmem:[#allocation5 + $0x18] sm:$0xff]  ;;  %v360_v56 = vld [vmem:[#allocation5] sm:$0xff]  ;;  %s1259_s28 = sshll.u32 %s257_s10, 4  ;;  %s1245_s17 = scalar_lea.sflag [#allocation4], %s1744_s27  ;;  %s2237_s28 = int_to_ptr.vmem [resolvable:$true] %s1259_s28 }
  0x5b   : > { %v300_v19 = vsel %vm298_vm0, %v275_v18, 0  ;;  %v399_v30 = vsel %vm398_vm2, %v377_v24, 0.0  ;;  %v412_v31 = vsel %vm398_vm2, %v379_v26, 0.0  ;;  %v541_v34 = vld [vmem:[#allocation5 + $0x68] sm:$0xff]  ;;  %v385_v35 = vmul.f32 %v369_v28, %v1759_v1  ;;  %v371_v37 = vld [vmem:[#allocation5 + $0x198] sm:$0xff]  ;;  %v362_v61 = vld [vmem:[#allocation5 + $0x50] sm:$0xff] }
  0x5c   : > { %308 = vmatpush1.bf16.msra.mxu0 %v273_v16  ;;  %v425_v32 = vsel %vm398_vm2, %v381_v27, 0.0  ;;  %v400_v36 = vrot.slane %v399_v30, 4  ;;  %v438_v38 = vsel %vm398_vm2, %v383_v29, 0.0  ;;  %v413_v39 = vrot.slane %v412_v31, 4  ;;  %v543_v41 = vld [vmem:[#allocation5 + $0xb8] sm:$0xff]  ;;  %v545_v51 = vld [vmem:[#allocation5 + $0x108] sm:$0xff] }
  0x5d   : > { %1348 = vmatprep.subr.msk.bf16.mxu0 %vm298_vm0, %v276_v17  ;;  %v426_v40 = vrot.slane %v425_v32, 4  ;;  %v555_v42 = vmul.f32 %v539_v33, %v1762_v2  ;;  %v557_v43 = vmul.f32 %v541_v34, %v1762_v2  ;;  %v387_v44 = vmul.f32 %v371_v37, %v1759_v1  ;;  %v373_v54 = vld [vmem:[#allocation5 + $0x1e8] sm:$0xff]  ;;  %v375_v57 = vld [vmem:[#allocation5 + $0x238] sm:$0xff]  ;;  %v364_v13 = vld [vmem:[#allocation5 + $0xa0] sm:$0xff]  ;;  %s1491_s12 = scalar_lea.vmem %s2237_s28, 256  ;;  %s1568_s22 = smov [#allocation7]  }
  0x5e   : > { %v401_v45 = vadd.f32 %v400_v36, %v399_v30  ;;  %v439_v46 = vrot.slane %v438_v38, 4  ;;  %v451_v47 = vsel %vm398_vm2, %v385_v35, 0.0  ;;  %v559_v48 = vmul.f32 %v543_v41, %v1762_v2  ;;  %v547_v62 = vld [vmem:[#allocation5 + $0x158] sm:$0xff]  ;;  %v538_v26 = vld [vmem:[#allocation5 + $0x10] sm:$0xff]  ;;  %v540_v27 = vld [vmem:[#allocation5 + $0x60] sm:$0xff]  ;;  %p1492_p4 = scmp.ne.s32.totalorder %s2237_s28, %s1491_s12  ;;  %s1495_s6 = sshll.u32 %s1568_s22, 4  ;;  %s1496_s6 = int_to_ptr.vmem [resolvable:$false] %s1495_s6 }
  0x5f   : > { %v414_v49 = vadd.f32 %v413_v39, %v412_v31  ;;  %v427_v50 = vadd.f32 %v426_v40, %v425_v32  ;;  %v576_v52 = vsel %vm398_vm2, %v555_v42, 0.0  ;;  %v589_v53 = vsel %vm398_vm2, %v557_v43, 0.0  ;;  %v551_v23 = vld [vmem:[#allocation5 + $0x1f8] sm:$0xff]  ;;  %v366_v34 = vld [vmem:[#allocation5 + $0xf0] sm:$0xff]  ;;  %v709_v40 = vld [vmem:[#allocation5 + $0x28] sm:$0xff]  ;;  %s1497_s14 = scalar_lea.vmem %s1496_s6, 512  ;;  %p1498_p10 = scmp.lt.s32.totalorder %s2237_s28, %s1496_s6 }
  0x60   : > { %310 = vmatpush1.bf16.msra.mxu0 %v300_v19  ;;  %v452_v55 = vrot.slane %v451_v47, 4  ;;  %v402_v58 = vrot.slane %v401_v45, 2  ;;  %v1818_v59 = vadd.f32 %v439_v46, %v438_v38  ;;  %v1821_v60 = vsel %vm398_vm2, %v387_v44, 0.0  ;;  %v549_v19 = vld [vmem:[#allocation5 + $0x1a8] sm:$0xff]  ;;  %v711_v41 = vld [vmem:[#allocation5 + $0x78] sm:$0xff]  ;;  %v542_v46 = vld [vmem:[#allocation5 + $0xb0] sm:$0xff]  ;;  %p1493_p6 = pnand %p1492_p4, %p1693_p12  ;;  %p1499_p11 = scmp.lt.s32.totalorder %s1497_s14, %s1491_s12 }
  0x61   : > { %v561_v63 = vmul.f32 %v545_v51, %v1762_v2  ;;  %v577_v0 = vrot.slane %v576_v52, 4  ;;  %v590_v3 = vrot.slane %v589_v53, 4  ;;  %v602_v6 = vsel %vm398_vm2, %v559_v48, 0.0 }
  0x62   : > { %v1826_v7 = vmul.f32 %v373_v54, %v1759_v1  ;;  %v415_v10 = vrot.slane %v414_v49, 2  ;;  %v428_v11 = vrot.slane %v427_v50, 2  ;;  %v376_v15 = vmul.f32 %v360_v56, %v1767_v4  ;;  %p1494_p8 = pneg %p1493_p6  ;;  %p1500_p3 = por %p1499_p11, %p1498_p10 }
  0x63   : > { %1349 = vmatmul.mubr.msk.bf16.vlgmr.msra.gmra.mrb[0].mxu0 %vm294_vm1, %v1420_v20  ;;  %v1830_v16 = vmul.f32 %v375_v57, %v1759_v1  ;;  %v1832_v17 = vadd.f32 %v452_v55, %v451_v47  ;;  %v465_v18 = vrot.slane %v1821_v60, 4  ;;  %v378_v20 = vmul.f32 %v362_v61, %v1767_v4  ;;  %v544_v57 = vld [vmem:[#allocation5 + $0x100] sm:$0xff] }
  0x64   : > { %v1836_v21 = vadd.f32 %v402_v58, %v401_v45  ;;  %v441_v22 = vrot.slane %v1818_v59, 2  ;;  %v563_v24 = vmul.f32 %v547_v62, %v1762_v2  ;;  %v603_v25 = vrot.slane %v602_v6, 4  ;;  %p1501_p7 = pnand %p1500_p3, %p1494_p8 }
  0x65   : > { %v578_v28 = vadd.f32 %v577_v0, %v576_v52  ;;  %v591_v1 = vadd.f32 %v590_v3, %v589_v53  ;;  %v615_v29 = vsel %vm398_vm2, %v561_v63, 0.0  ;;  %v380_v30 = vmul.f32 %v364_v13, %v1767_v4 }
  0x66   : > { %v1842_v31 = vadd.f32 %v415_v10, %v414_v49  ;;  %v1844_v32 = vadd.f32 %v428_v11, %v427_v50  ;;  %v1847_v33 = vmul.f32 %v549_v19, %v1762_v2  ;;  %v392_v35 = vrot.slane %v376_v15, 4  ;;  %v368_v49 = vld [vmem:[#allocation5 + $0x140] sm:$0xff]  ;;  %v713_v10 = vld [vmem:[#allocation5 + $0xc8] sm:$0xff] }
  0x67   : > { %v1850_v36 = vmul.f32 %v551_v23, %v1762_v2  ;;  %v406_v37 = vrot.slane %v378_v20, 4  ;;  %v554_v38 = vmul.f32 %v538_v26, %v1770_v5  ;;  %v556_v39 = vmul.f32 %v540_v27, %v1770_v5  ;;  %v879_v23 = vld [vmem:[#allocation5 + $0x38] sm:$0xff] }
  0x68   : > { %v404_v42 = vrot.slane %v1836_v21, 1  ;;  %v1855_v43 = vadd.f32 %v603_v25, %v602_v6  ;;  %v616_v44 = vrot.slane %v615_v29, 4  ;;  %v1858_v45 = vsel %vm398_vm2, %v563_v24, 0.0  ;;  %v881_v24 = vld [vmem:[#allocation5 + $0x88] sm:$0xff] }
  0x69   : > { %v579_v47 = vrot.slane %v578_v28, 2  ;;  %v592_v48 = vrot.slane %v591_v1, 2  ;;  %v1861_v50 = vmul.f32 %v366_v34, %v1767_v4  ;;  %v419_v51 = vrot.slane %v380_v30, 4 }
  0x6a   : > { %v417_v52 = vrot.slane %v1842_v31, 1  ;;  %v1864_v53 = vadd.f32 %v392_v35, %v376_v15  ;;  %v725_v54 = vmul.f32 %v709_v40, %v1778_v8  ;;  %v727_v55 = vmul.f32 %v711_v41, %v1778_v8  ;;  %v710_v40 = vld [vmem:[#allocation5 + $0x70] sm:$0xff] }
  0x6b   : > { %v1868_v56 = vadd.f32 %v406_v37, %v378_v20  ;;  %v1871_v58 = vmul.f32 %v542_v46, %v1770_v5  ;;  %v570_v61 = vrot.slane %v554_v38, 4  ;;  %v583_v62 = vrot.slane %v556_v39, 4  ;;  %v715_v20 = vld [vmem:[#allocation5 + $0x118] sm:$0xff]  ;;  %v370_v41 = vld [vmem:[#allocation5 + $0x190] sm:$0xff] }
  0x6c   : > { %v605_v63 = vrot.slane %v1855_v43, 2  ;;  %v1874_v0 = vadd.f32 %v616_v44, %v615_v29  ;;  %v629_v3 = vrot.slane %v1858_v45, 4  ;;  %v1878_v6 = vmul.f32 %v368_v49, %v1767_v4  ;;  %v708_v29 = vld [vmem:[#allocation5 + $0x20] sm:$0xff] }
  0x6d   : > { %v1880_v11 = vadd.f32 %v579_v47, %v578_v28  ;;  %v1882_v13 = vadd.f32 %v592_v48, %v591_v1  ;;  %v1884_v15 = vadd.f32 %v419_v51, %v380_v30  ;;  %v432_v19 = vrot.slane %v1861_v50, 4  ;;  %v883_v1 = vld [vmem:[#allocation5 + $0xd8] sm:$0xff]  ;;  %v372_v44 = vld [vmem:[#allocation5 + $0x1e0] sm:$0xff] }
  0x6e   : > { %v1889_v26 = vmul.f32 %v544_v57, %v1770_v5  ;;  %v1892_v27 = vsel %vm398_vm2, %v725_v54, 0.0  ;;  %v1895_v28 = vsel %vm398_vm2, %v727_v55, 0.0  ;;  %v1898_v34 = vadd.f32 %v570_v61, %v554_v38  ;;  %v546_v38 = vld [vmem:[#allocation5 + $0x150] sm:$0xff]  ;;  %v712_v57 = vld [vmem:[#allocation5 + $0xc0] sm:$0xff] }
  0x6f   : > { %v1900_v35 = vadd.f32 %v583_v62, %v556_v39  ;;  %v1904_v46 = vmul.f32 %v713_v10, %v1778_v8  ;;  %v1907_v47 = vmul.f32 %v715_v20, %v1778_v8  ;;  %v1910_v48 = vmul.f32 %v879_v23, %v1781_v9  ;;  %v374_v10 = vld [vmem:[#allocation5 + $0x230] sm:$0xff] }
  0x70   : > { %v1913_v49 = vmul.f32 %v881_v24, %v1781_v9  ;;  %v1918_v54 = vmul.f32 %v883_v1, %v1781_v9  ;;  %v1921_v55 = vmul.f32 %v708_v29, %v1789_v12  ;;  %v1924_v61 = vmul.f32 %v710_v40, %v1789_v12  ;;  %v553_v29 = vld [vmem:[#allocation5 + $0x248] sm:$0xff] }
  0x71   : > { %v477_v62 = vsel %vm398_vm2, %v1826_v7, 0.0  ;;  %v1929_v20 = vmul.f32 %v370_v41, %v1767_v4  ;;  %v1932_v23 = vmul.f32 %v372_v44, %v1767_v4  ;;  %v490_v1 = vsel %vm398_vm2, %v1830_v16, 0.0 }
  0x72   : > { %v478_v24 = vrot.slane %v477_v62, 4  ;;  %v1938_v40 = vmul.f32 %v546_v38, %v1770_v5  ;;  %v466_v7 = vadd.f32 %v465_v18, %v1821_v60  ;;  %v491_v30 = vrot.slane %v490_v1, 4 }
  0x73   : > { %v641_v41 = vsel %vm398_vm2, %v1847_v33, 0.0  ;;  %v1946_v44 = vmul.f32 %v712_v57, %v1789_v12  ;;  %v454_v25 = vrot.slane %v1832_v17, 2  ;;  %v1950_v51 = vmul.f32 %v374_v10, %v1767_v4 }
  0x74   : > { %v479_v16 = vadd.f32 %v478_v24, %v477_v62  ;;  %v1953_v38 = vadd.f32 %v432_v19, %v1861_v50  ;;  %v442_v60 = vadd.f32 %v441_v22, %v1818_v59  ;;  %v467_v18 = vrot.slane %v466_v7, 2 }
  0x75   : > { %v492_v37 = vadd.f32 %v491_v30, %v490_v1  ;;  %v569_v33 = vmul.f32 %v553_v29, %v1762_v2  ;;  %v430_v12 = vrot.slane %v1844_v32, 1  ;;  %v455_v57 = vadd.f32 %v454_v25, %v1832_v17 }
  0x76   : > { %v480_v39 = vrot.slane %v479_v16, 2  ;;  %v642_v62 = vrot.slane %v641_v41, 4  ;;  %v405_v4 = vadd.f32 %v404_v42, %v1836_v21  ;;  %v418_v50 = vadd.f32 %v417_v52, %v1842_v31 }
  0x77   : > { %v443_v19 = vrot.slane %v442_v60, 1  ;;  %v468_v59 = vadd.f32 %v467_v18, %v466_v7  ;;  %v456_v22 = vrot.slane %v455_v57, 1  ;;  %v493_v10 = vrot.slane %v492_v37, 2 }
  0x78   : > { %v481_v30 = vadd.f32 %v480_v39, %v479_v16  ;;  %v654_v2 = vsel %vm398_vm2, %v1850_v36, 0.0  ;;  %v431_v17 = vadd.f32 %v430_v12, %v1844_v32  ;;  %v606_v21 = vadd.f32 %v605_v63, %v1855_v43 }
  0x79   : > { %v469_v25 = vrot.slane %v468_v59, 1  ;;  %v444_v42 = vadd.f32 %v443_v19, %v442_v60  ;;  %v494_v1 = vadd.f32 %v493_v10, %v492_v37  ;;  %v457_v31 = vadd.f32 %v456_v22, %v455_v57 }
  0x7a   : > { %v482_v24 = vrot.slane %v481_v30, 1  ;;  %v527_v52 = vsel %vm513_vm3, %v418_v50, %v405_v4  ;;  %v618_v39 = vrot.slane %v1874_v0, 2  ;;  %v630_v32 = vadd.f32 %v629_v3, %v1858_v45 }
  0x7b   : > { %v470_v29 = vadd.f32 %v469_v25, %v468_v59  ;;  %v655_v36 = vrot.slane %v654_v2, 4  ;;  %v528_v43 = vsel %vm515_vm4, %v431_v17, %v527_v52  ;;  %v581_v63 = vrot.slane %v1880_v11, 1  ;;  %v717_v17 = vld [vmem:[#allocation5 + $0x168] sm:$0xff] }
  0x7c   : > { %v594_v37 = vrot.slane %v1882_v13, 1  ;;  %v483_v7 = vadd.f32 %v482_v24, %v481_v30  ;;  %v495_v16 = vrot.slane %v494_v1, 1  ;;  %v529_v60 = vsel %vm517_vm5, %v444_v42, %v528_v43 }
  0x7d   : > { %v607_v18 = vrot.slane %v606_v21, 1  ;;  %v530_v12 = vsel %vm519_vm6, %v457_v31, %v529_v60  ;;  %v582_v57 = vadd.f32 %v581_v63, %v1880_v11  ;;  %v619_v45 = vadd.f32 %v618_v39, %v1874_v0  ;;  %v721_v63 = vld [vmem:[#allocation5 + $0x208] sm:$0xff] }
  0x7e   : > { %v595_v4 = vadd.f32 %v594_v37, %v1882_v13  ;;  %v531_v3 = vsel %vm521_vm7, %v470_v29, %v530_v12  ;;  %v631_v50 = vrot.slane %v630_v32, 2  ;;  %v458_v19 = vrot.slane %v1929_v20, 4  ;;  %v719_v29 = vld [vmem:[#allocation5 + $0x1b8] sm:$0xff] }
  0x7f   : > { %v608_v59 = vadd.f32 %v607_v18, %v606_v21  ;;  %v620_v22 = vrot.slane %v619_v45, 1  ;;  %v643_v30 = vadd.f32 %v642_v62, %v641_v41  ;;  %v656_v10 = vadd.f32 %v655_v36, %v654_v2 }
  0x80   : > { %v496_v25 = vadd.f32 %v495_v16, %v494_v1  ;;  %v632_v42 = vadd.f32 %v631_v50, %v630_v32  ;;  %v667_v24 = vsel %vm398_vm2, %v569_v33, 0.0  ;;  %v697_v11 = vsel %vm513_vm3, %v595_v4, %v582_v57 }
  0x81   : > { %v532_v0 = vsel %vm523_vm8, %v483_v7, %v531_v3  ;;  %v644_v13 = vrot.slane %v643_v30, 2  ;;  %v657_v31 = vrot.slane %v656_v10, 2  ;;  %v621_v52 = vadd.f32 %v620_v22, %v619_v45  ;;  %v723_v45 = vld [vmem:[#allocation5 + $0x258] sm:$0xff] }
  0x82   : > { %v668_v39 = vrot.slane %v667_v24, 4  ;;  %v733_v21 = vmul.f32 %v717_v17, %v1778_v8  ;;  %v772_v41 = vsel %vm398_vm2, %v1904_v46, 0.0  ;;  %v633_v62 = vrot.slane %v632_v42, 1 }
  0x83   : > { %v645_v2 = vadd.f32 %v644_v13, %v643_v30  ;;  %v698_v1 = vsel %vm515_vm4, %v608_v59, %v697_v11  ;;  %v421_v33 = vrot.slane %v1884_v15, 2  ;;  %v1218_v32 = vlaneseq }
  0x84   : > { %v1997_v36 = vsel %vm525_vm9, %v496_v25, %v532_v0  ;;  %v669_v43 = vadd.f32 %v668_v39, %v667_v24  ;;  %v2301_v37 = vrot.slane %v1892_v27, 4  ;;  %v658_v16 = vadd.f32 %v657_v31, %v656_v10 }
  0x85   : > { %v735_v60 = vmul.f32 %v719_v29, %v1778_v8  ;;  %v2302_v46 = vrot.slane %v1895_v28, 4  ;;  %v773_v12 = vrot.slane %v772_v41, 4  ;;  %v646_v57 = vrot.slane %v645_v2, 1 }
  0x86   : > { %v748_v7 = vadd.f32 %v2301_v37, %v1892_v27  ;;  %v699_v4 = vsel %vm517_vm5, %v621_v52, %v698_v1  ;;  %v785_v50 = vsel %vm398_vm2, %v1907_v47, 0.0  ;;  %v634_v59 = vadd.f32 %v633_v62, %v632_v42 }
  0x87   : > { %v761_v18 = vadd.f32 %v2302_v46, %v1895_v28  ;;  %v737_v22 = vmul.f32 %v721_v63, %v1778_v8  ;;  %v774_v30 = vadd.f32 %v773_v12, %v772_v41  ;;  %v670_v10 = vrot.slane %v669_v43, 2 }
  0x88   : > { %v749_v3 = vrot.slane %v748_v7, 2  ;;  %v786_v25 = vrot.slane %v785_v50, 4  ;;  %v798_v24 = vsel %vm398_vm2, %v733_v21, 0.0  ;;  %v739_v28 = vmul.f32 %v723_v45, %v1778_v8 }
  0x89   : > { %v762_v27 = vrot.slane %v761_v18, 2  ;;  %v775_v0 = vrot.slane %v774_v30, 2  ;;  %v799_v13 = vrot.slane %v798_v24, 4  ;;  %v647_v31 = vadd.f32 %v646_v57, %v645_v2 }
  0x8a   : > { %v750_v17 = vadd.f32 %v749_v3, %v748_v7  ;;  %v659_v52 = vrot.slane %v658_v16, 1  ;;  %v787_v29 = vadd.f32 %v786_v25, %v785_v50  ;;  %v811_v1 = vsel %vm398_vm2, %v735_v60, 0.0 }
  0x8b   : > { %v763_v11 = vadd.f32 %v762_v27, %v761_v18  ;;  %v776_v42 = vadd.f32 %v775_v0, %v774_v30  ;;  %v800_v62 = vadd.f32 %v799_v13, %v798_v24  ;;  %v671_v41 = vadd.f32 %v670_v10, %v669_v43  ;;  %v359_v43 = vld [vmem:[%s2283_s4 + $0x8] sm:$0xff] }
  0x8c   : > { %v751_v39 = vrot.slane %v750_v17, 1  ;;  %v788_v37 = vrot.slane %v787_v29, 2  ;;  %v812_v7 = vrot.slane %v811_v1, 4  ;;  %v824_v8 = vsel %vm398_vm2, %v737_v22, 0.0  ;;  %v885_v24 = vld [vmem:[#allocation5 + $0x128] sm:$0xff]  ;;  %v887_v22 = vld [vmem:[#allocation5 + $0x178] sm:$0xff] }
  0x8d   : > { %v764_v47 = vrot.slane %v763_v11, 1  ;;  %v777_v21 = vrot.slane %v776_v42, 1  ;;  %v801_v12 = vrot.slane %v800_v62, 2  ;;  %v700_v18 = vsel %vm519_vm6, %v634_v59, %v699_v4 }
  0x8e   : > { %v752_v63 = vadd.f32 %v751_v39, %v750_v17  ;;  %v789_v2 = vadd.f32 %v788_v37, %v787_v29  ;;  %v813_v57 = vadd.f32 %v812_v7, %v811_v1  ;;  %v825_v45 = vrot.slane %v824_v8, 4 }
  0x8f   : > { %v765_v46 = vadd.f32 %v764_v47, %v763_v11  ;;  %v660_v3 = vadd.f32 %v659_v52, %v658_v16  ;;  %v778_v50 = vadd.f32 %v777_v21, %v776_v42  ;;  %v802_v27 = vadd.f32 %v801_v12, %v800_v62  ;;  %v889_v47 = vld [vmem:[#allocation5 + $0x1c8] sm:$0xff]  ;;  %v891_v42 = vld [vmem:[#allocation5 + $0x218] sm:$0xff] }
  0x90   : > { %v837_v30 = vsel %vm398_vm2, %v739_v28, 0.0  ;;  %v790_v60 = vrot.slane %v789_v2, 1  ;;  %v814_v10 = vrot.slane %v813_v57, 2  ;;  %v826_v17 = vadd.f32 %v825_v45, %v824_v8  ;;  %v893_v45 = vld [vmem:[#allocation5 + $0x268] sm:$0xff] }
  0x91   : > { %v838_v25 = vrot.slane %v837_v30, 4  ;;  %v672_v11 = vrot.slane %v671_v41, 1  ;;  %v701_v4 = vsel %vm521_vm7, %v647_v31, %v700_v18  ;;  %v803_v59 = vrot.slane %v802_v27, 1 }
  0x92   : > { %v867_v16 = vsel %vm513_vm3, %v765_v46, %v752_v63  ;;  %v791_v0 = vadd.f32 %v790_v60, %v789_v2  ;;  %v815_v13 = vadd.f32 %v814_v10, %v813_v57  ;;  %v827_v52 = vrot.slane %v826_v17, 2 }
  0x93   : > { %v839_v28 = vadd.f32 %v838_v25, %v837_v30  ;;  %v2022_v39 = vadd.f32 %v1997_v36, %v359_v43  ;;  %v868_v29 = vsel %vm515_vm4, %v778_v50, %v867_v16  ;;  %v901_v62 = vmul.f32 %v885_v24, %v1781_v9 }
  0x94   : > { %v903_v1 = vmul.f32 %v887_v22, %v1781_v9  ;;  %v2028_v31 = vsel %vm523_vm8, %v660_v3, %v701_v4  ;;  %v804_v37 = vadd.f32 %v803_v59, %v802_v27  ;;  %v828_v63 = vadd.f32 %v827_v52, %v826_v17 }
  0x95   : > { %v840_v7 = vrot.slane %v839_v28, 2  ;;  %v2030_v46 = vadd.f32 %v672_v11, %v671_v41  ;;  %v869_v21 = vsel %vm517_vm5, %v791_v0, %v868_v29  ;;  %v916_v36 = vsel %vm398_vm2, %v1910_v48, 0.0 }
  0x96   : > { %v929_v12 = vsel %vm398_vm2, %v1913_v49, 0.0  ;;  %v816_v8 = vrot.slane %v815_v13, 1  ;;  %v905_v18 = vmul.f32 %v889_v47, %v1781_v9  ;;  %v907_v2 = vmul.f32 %v891_v42, %v1781_v9 }
  0x97   : > { %v917_v57 = vrot.slane %v916_v36, 4  ;;  %v930_v3 = vrot.slane %v929_v12, 4  ;;  %v942_v41 = vsel %vm398_vm2, %v1918_v54, 0.0  ;;  %v955_v50 = vsel %vm398_vm2, %v901_v62, 0.0 }
  0x98   : > { %v968_v27 = vsel %vm398_vm2, %v903_v1, 0.0  ;;  %v829_v30 = vrot.slane %v828_v63, 1  ;;  %v2043_v48 = vadd.f32 %v840_v7, %v839_v28  ;;  %v870_v49 = vsel %vm519_vm6, %v804_v37, %v869_v21 }
  0x99   : > { %v918_v43 = vadd.f32 %v917_v57, %v916_v36  ;;  %v931_v60 = vadd.f32 %v930_v3, %v929_v12  ;;  %v943_v10 = vrot.slane %v942_v41, 4  ;;  %v956_v17 = vrot.slane %v955_v50, 4 }
  0x9a   : > { %v969_v25 = vrot.slane %v968_v27, 4  ;;  %v817_v24 = vadd.f32 %v816_v8, %v815_v13  ;;  %v909_v22 = vmul.f32 %v893_v45, %v1781_v9  ;;  %v981_v54 = vsel %vm398_vm2, %v905_v18, 0.0 }
  0x9b   : > { %v919_v11 = vrot.slane %v918_v43, 2  ;;  %v932_v4 = vrot.slane %v931_v60, 2  ;;  %v944_v59 = vadd.f32 %v943_v10, %v942_v41  ;;  %v957_v16 = vadd.f32 %v956_v17, %v955_v50 }
  0x9c   : > { %v970_v0 = vadd.f32 %v969_v25, %v968_v27  ;;  %v830_v52 = vadd.f32 %v829_v30, %v828_v63  ;;  %v982_v29 = vrot.slane %v981_v54, 4  ;;  %v994_v47 = vsel %vm398_vm2, %v907_v2, 0.0  ;;  %v1049_v30 = vld [vmem:[#allocation5 + $0x48] sm:$0xff]  ;;  %v1051_v25 = vld [vmem:[#allocation5 + $0x98] sm:$0xff] }
  0x9d   : > { %v920_v28 = vadd.f32 %v919_v11, %v918_v43  ;;  %v842_v42 = vrot.slane %v2043_v48, 1  ;;  %v933_v62 = vadd.f32 %v932_v4, %v931_v60  ;;  %v945_v1 = vrot.slane %v944_v59, 2  ;;  %v1053_v11 = vld [vmem:[#allocation5 + $0xe8] sm:$0xff] }
  0x9e   : > { %v958_v37 = vrot.slane %v957_v16, 2  ;;  %v971_v7 = vrot.slane %v970_v0, 2  ;;  %v983_v9 = vadd.f32 %v982_v29, %v981_v54  ;;  %v995_v21 = vrot.slane %v994_v47, 4 }
  0x9f   : > { %v921_v13 = vrot.slane %v920_v28, 1  ;;  %v934_v36 = vrot.slane %v933_v62, 1  ;;  %v946_v12 = vadd.f32 %v945_v1, %v944_v59  ;;  %v1007_v18 = vsel %vm398_vm2, %v909_v22, 0.0 }
  0xa0   : > { %v959_v8 = vadd.f32 %v958_v37, %v957_v16  ;;  %v972_v63 = vadd.f32 %v971_v7, %v970_v0  ;;  %v984_v45 = vrot.slane %v983_v9, 2  ;;  %v996_v3 = vadd.f32 %v995_v21, %v994_v47  ;;  %v1055_v16 = vld [vmem:[#allocation5 + $0x138] sm:$0xff]  ;;  %v1057_v47 = vld [vmem:[#allocation5 + $0x188] sm:$0xff] }
  0xa1   : > { %v922_v57 = vadd.f32 %v921_v13, %v920_v28  ;;  %v935_v41 = vadd.f32 %v934_v36, %v933_v62  ;;  %v947_v2 = vrot.slane %v946_v12, 1  ;;  %v1008_v27 = vrot.slane %v1007_v18, 4  ;;  %v1061_v36 = vld [vmem:[#allocation5 + $0x228] sm:$0xff] }
  0xa2   : > { %v960_v50 = vrot.slane %v959_v8, 1  ;;  %v871_v43 = vsel %vm521_vm7, %v817_v24, %v870_v49  ;;  %v973_v60 = vrot.slane %v972_v63, 1  ;;  %v985_v10 = vadd.f32 %v984_v45, %v983_v9  ;;  %v1059_v24 = vld [vmem:[#allocation5 + $0x1d8] sm:$0xff] }
  0xa3   : > { %v997_v17 = vrot.slane %v996_v3, 2  ;;  %v948_v54 = vadd.f32 %v947_v2, %v946_v12  ;;  %v1009_v59 = vadd.f32 %v1008_v27, %v1007_v18  ;;  %v1037_v22 = vsel %vm513_vm3, %v935_v41, %v922_v57 }
  0xa4   : > { %v961_v4 = vadd.f32 %v960_v50, %v959_v8  ;;  %v974_v0 = vadd.f32 %v973_v60, %v972_v63  ;;  %v986_v28 = vrot.slane %v985_v10, 1  ;;  %v1065_v62 = vmul.f32 %v1049_v30, %v1793_v14 }
  0xa5   : > { %v998_v29 = vadd.f32 %v997_v17, %v996_v3  ;;  %v1010_v1 = vrot.slane %v1009_v59, 2  ;;  %v1038_v49 = vsel %vm515_vm4, %v948_v54, %v1037_v22  ;;  %v1067_v37 = vmul.f32 %v1051_v25, %v1793_v14 }
  0xa6   : > { %v1069_v13 = vmul.f32 %v1053_v11, %v1793_v14  ;;  %v703_v7 = vsel %vm525_vm9, %v2030_v46, %v2028_v31  ;;  %v1039_v21 = vsel %vm517_vm5, %v961_v4, %v1038_v49  ;;  %v1071_v12 = vmul.f32 %v1055_v16, %v1793_v14 }
  0xa7   : > { %v999_v9 = vrot.slane %v998_v29, 1  ;;  %v843_v8 = vadd.f32 %v842_v42, %v2043_v48  ;;  %v872_v18 = vsel %vm523_vm8, %v830_v52, %v871_v43  ;;  %v987_v57 = vadd.f32 %v986_v28, %v985_v10  ;;  %v1063_v42 = vld [vmem:[#allocation5 + $0x278] sm:$0xff] }
  0xa8   : > { %v1073_v63 = vmul.f32 %v1057_v47, %v1793_v14  ;;  %v1011_v45 = vadd.f32 %v1010_v1, %v1009_v59  ;;  %v1040_v3 = vsel %vm519_vm6, %v974_v0, %v1039_v21  ;;  %v1075_v41 = vmul.f32 %v1059_v24, %v1793_v14 }
  0xa9   : > { %v1086_v31 = vsel %vm398_vm2, %v1065_v62, 0.0  ;;  %v1077_v46 = vmul.f32 %v1061_v36, %v1793_v14  ;;  %v1099_v50 = vsel %vm398_vm2, %v1067_v37, 0.0  ;;  %v1112_v27 = vsel %vm398_vm2, %v1069_v13, 0.0 }
  0xaa   : > { %v1087_v2 = vrot.slane %v1086_v31, 4  ;;  %v1000_v48 = vadd.f32 %v999_v9, %v998_v29  ;;  %v1100_v52 = vrot.slane %v1099_v50, 4  ;;  %v1113_v30 = vrot.slane %v1112_v27, 4 }
  0xab   : > { %v1125_v43 = vsel %vm398_vm2, %v1071_v12, 0.0  ;;  %v1041_v60 = vsel %vm521_vm7, %v987_v57, %v1040_v3  ;;  %v1138_v25 = vsel %vm398_vm2, %v1073_v63, 0.0  ;;  %v1151_v59 = vsel %vm398_vm2, %v1075_v41, 0.0 }
  0xac   : > { %v1088_v10 = vadd.f32 %v1087_v2, %v1086_v31  ;;  %v1126_v17 = vrot.slane %v1125_v43, 4  ;;  %v1101_v11 = vadd.f32 %v1100_v52, %v1099_v50  ;;  %v1114_v54 = vadd.f32 %v1113_v30, %v1112_v27 }
  0xad   : > { %v1139_v4 = vrot.slane %v1138_v25, 4  ;;  %v1079_v22 = vmul.f32 %v1063_v42, %v1793_v14  ;;  %v1152_v28 = vrot.slane %v1151_v59, 4  ;;  %v1012_v29 = vrot.slane %v1011_v45, 1 }
  0xae   : > { %v1089_v16 = vrot.slane %v1088_v10, 2  ;;  %v1127_v0 = vadd.f32 %v1126_v17, %v1125_v43  ;;  %v1102_v47 = vrot.slane %v1101_v11, 2  ;;  %v1115_v62 = vrot.slane %v1114_v54, 2 }
  0xaf   : > { %v1140_v1 = vadd.f32 %v1139_v4, %v1138_v25  ;;  %v1153_v37 = vadd.f32 %v1152_v28, %v1151_v59  ;;  %v1164_v13 = vsel %vm398_vm2, %v1077_v46, 0.0  ;;  %v1177_v14 = vsel %vm398_vm2, %v1079_v22, 0.0  ;;  %v548_v46 = vld [vmem:[#allocation5 + $0x1a0] sm:$0xff] }
  0xb0   : > { %v1090_v49 = vadd.f32 %v1089_v16, %v1088_v10  ;;  %v1128_v24 = vrot.slane %v1127_v0, 2  ;;  %v1103_v9 = vadd.f32 %v1102_v47, %v1101_v11  ;;  %v1116_v21 = vadd.f32 %v1115_v62, %v1114_v54 }
  0xb1   : > { %v1141_v36 = vrot.slane %v1140_v1, 2  ;;  %v1165_v12 = vrot.slane %v1164_v13, 4  ;;  %v1154_v3 = vrot.slane %v1153_v37, 2  ;;  %v707_v27 = vadd.f32 %v703_v7, %v2022_v39 }
  0xb2   : > { %v1091_v57 = vrot.slane %v1090_v49, 1  ;;  %v1129_v63 = vadd.f32 %v1128_v24, %v1127_v0  ;;  %v1104_v41 = vrot.slane %v1103_v9, 1  ;;  %v1117_v31 = vrot.slane %v1116_v21, 1 }
  0xb3   : > { %v1142_v2 = vadd.f32 %v1141_v36, %v1140_v1  ;;  %v1166_v50 = vadd.f32 %v1165_v12, %v1164_v13  ;;  %v873_v42 = vsel %vm525_vm9, %v843_v8, %v872_v18  ;;  %v1178_v30 = vrot.slane %v1177_v14, 4 }
  0xb4   : > { %v1092_v52 = vadd.f32 %v1091_v57, %v1090_v49  ;;  %v1013_v43 = vadd.f32 %v1012_v29, %v1011_v45  ;;  %v1042_v10 = vsel %vm523_vm8, %v1000_v48, %v1041_v60  ;;  %v1105_v17 = vadd.f32 %v1104_v41, %v1103_v9 }
  0xb5   : > { %v1155_v25 = vadd.f32 %v1154_v3, %v1153_v37  ;;  %v1130_v11 = vrot.slane %v1129_v63, 1  ;;  %v1143_v54 = vrot.slane %v1142_v2, 1  ;;  %v1167_v4 = vrot.slane %v1166_v50, 2 }
  0xb6   : > { %v2303_v59 = vrot.slane %v1864_v53, 2  ;;  %v2085_v16 = vshrl.u32 %v1218_v32, 7  ;;  %v1118_v39 = vadd.f32 %v1117_v31, %v1116_v21  ;;  %v2304_v7 = vrot.slane %v1868_v56, 2 }
  0xb7   : > { %v2091_v18 = vmul.f32 %v548_v46, %v1770_v5  ;;  %v2093_v45 = vadd.f32 %v873_v42, %v707_v27  ;;  %v1179_v48 = vadd.f32 %v1178_v30, %v1177_v14  ;;  %v1207_v60 = vsel %vm513_vm3, %v1105_v17, %v1092_v52 }
  0xb8   : > { %v395_v22 = vadd.f32 %v2303_v59, %v1864_v53  ;;  %v409_v8 = vadd.f32 %v2304_v7, %v1868_v56  ;;  %v2097_v28 = vsel %vm525_vm9, %v1013_v43, %v1042_v10  ;;  %v1156_v53 = vrot.slane %v1155_v25, 1 }
  0xb9   : > { %v422_v29 = vadd.f32 %v421_v33, %v1884_v15  ;;  %v1131_v47 = vadd.f32 %v1130_v11, %v1129_v63  ;;  %v1144_v56 = vadd.f32 %v1143_v54, %v1142_v2  ;;  %v1168_v62 = vadd.f32 %v1167_v4, %v1166_v50  ;;  %v1429_v11 = vld [vmem:[%s1748_s7 + $0x10] sm:$0xff] }
  0xba   : > { %v396_v0 = vrot.slane %v395_v22, 1  ;;  %v410_v32 = vrot.slane %v409_v8, 1  ;;  %v434_v5 = vrot.slane %v1953_v38, 2  ;;  %v1208_v1 = vsel %vm515_vm4, %v1118_v39, %v1207_v60 }
  0xbb   : > { %v423_v37 = vrot.slane %v422_v29, 1  ;;  %v1180_v13 = vrot.slane %v1179_v48, 2  ;;  %v2305_v21 = vrot.slane %v1878_v6, 4  ;;  %v459_v15 = vadd.f32 %v458_v19, %v1929_v20  ;;  %v550_v19 = vld [vmem:[#allocation5 + $0x1f0] sm:$0xff] }
  0xbc   : > { %v397_v49 = vadd.f32 %v396_v0, %v395_v22  ;;  %v411_v24 = vadd.f32 %v410_v32, %v409_v8  ;;  %v435_v9 = vadd.f32 %v434_v5, %v1953_v38  ;;  %v2111_v33 = vadd.f32 %v1156_v53, %v1155_v25  ;;  %v552_v8 = vld [vmem:[#allocation5 + $0x240] sm:$0xff] }
  0xbd   : > { %v446_v36 = vadd.f32 %v2305_v21, %v1878_v6  ;;  %v424_v12 = vadd.f32 %v423_v37, %v422_v29  ;;  %v471_v57 = vrot.slane %v1932_v23, 4  ;;  %v484_v63 = vrot.slane %v1950_v51, 4 }
  0xbe   : > { %v1209_v3 = vsel %vm517_vm5, %v1131_v47, %v1208_v1  ;;  %v436_v14 = vrot.slane %v435_v9, 1  ;;  %v460_v38 = vrot.slane %v459_v15, 2  ;;  %v1169_v31 = vrot.slane %v1168_v62, 1 }
  0xbf   : > { %v447_v41 = vrot.slane %v446_v36, 2  ;;  %v472_v6 = vadd.f32 %v471_v57, %v1932_v23  ;;  %v485_v2 = vadd.f32 %v484_v63, %v1950_v51  ;;  %v514_v20 = vsel %vm513_vm3, %v411_v24, %v397_v49 }
  0xc0   : > { %v2119_v50 = vadd.f32 %v1180_v13, %v1179_v48  ;;  %v437_v27 = vadd.f32 %v436_v14, %v435_v9  ;;  %v461_v52 = vadd.f32 %v460_v38, %v459_v15  ;;  %v1210_v30 = vsel %vm519_vm6, %v1144_v56, %v1209_v3 }
  0xc1   : > { %v448_v42 = vadd.f32 %v447_v41, %v446_v36  ;;  %v473_v46 = vrot.slane %v472_v6, 2  ;;  %v486_v43 = vrot.slane %v485_v2, 2  ;;  %v516_v10 = vsel %vm515_vm4, %v424_v12, %v514_v20  ;;  %v714_v20 = vld [vmem:[#allocation5 + $0x110] sm:$0xff] }
  0xc2   : > { %v462_v25 = vrot.slane %v461_v52, 1  ;;  %v518_v23 = vsel %vm517_vm5, %v437_v27, %v516_v10  ;;  %v566_v51 = vmul.f32 %v1429_v11, %v550_v19  ;;  %v572_v59 = vrot.slane %v1898_v34, 2  ;;  %v718_v10 = vld [vmem:[#allocation5 + $0x1b0] sm:$0xff] }
  0xc3   : > { %v449_v17 = vrot.slane %v448_v42, 1  ;;  %v474_v54 = vadd.f32 %v473_v46, %v472_v6  ;;  %v487_v4 = vadd.f32 %v486_v43, %v485_v2  ;;  %v585_v22 = vrot.slane %v1900_v35, 2  ;;  %v716_v43 = vld [vmem:[#allocation5 + $0x160] sm:$0xff] }
  0xc4   : > { %v463_v7 = vadd.f32 %v462_v25, %v461_v52  ;;  %v2306_v48 = vrot.slane %v1871_v58, 4  ;;  %v609_v0 = vrot.slane %v1889_v26, 4  ;;  %v573_v29 = vadd.f32 %v572_v59, %v1898_v34 }
  0xc5   : > { %v450_v39 = vadd.f32 %v449_v17, %v448_v42  ;;  %v475_v53 = vrot.slane %v474_v54, 1  ;;  %v488_v32 = vrot.slane %v487_v4, 1  ;;  %v586_v47 = vadd.f32 %v585_v22, %v1900_v35 }
  0xc6   : > { %v597_v60 = vadd.f32 %v2306_v48, %v1871_v58  ;;  %v610_v1 = vadd.f32 %v609_v0, %v1889_v26  ;;  %v622_v49 = vrot.slane %v1938_v40, 4  ;;  %v568_v13 = vmul.f32 %v1429_v11, %v552_v8 }
  0xc7   : > { %v520_v56 = vsel %vm519_vm6, %v450_v39, %v518_v23  ;;  %v476_v24 = vadd.f32 %v475_v53, %v474_v54  ;;  %v574_v58 = vrot.slane %v573_v29, 1  ;;  %v587_v9 = vrot.slane %v586_v47, 1  ;;  %v1430_v23 = vld [vmem:[%s1748_s7 + $0x20] sm:$0xff] }
  0xc8   : > { %v598_v5 = vrot.slane %v597_v60, 2  ;;  %v522_v37 = vsel %vm521_vm7, %v463_v7, %v520_v56  ;;  %v611_v36 = vrot.slane %v610_v1, 2  ;;  %v623_v15 = vadd.f32 %v622_v49, %v1938_v40 }
  0xc9   : > { %v2138_v34 = vadd.f32 %v1169_v31, %v1168_v62  ;;  %v575_v35 = vadd.f32 %v574_v58, %v573_v29  ;;  %v635_v12 = vrot.slane %v2091_v18, 4  ;;  %v648_v57 = vrot.slane %v566_v51, 4 }
  0xca   : > { %v599_v21 = vadd.f32 %v598_v5, %v597_v60  ;;  %v489_v63 = vadd.f32 %v488_v32, %v487_v4  ;;  %v588_v26 = vadd.f32 %v587_v9, %v586_v47  ;;  %v612_v14 = vadd.f32 %v611_v36, %v610_v1  ;;  %v722_v1 = vld [vmem:[#allocation5 + $0x250] sm:$0xff] }
  0xcb   : > { %v524_v41 = vsel %vm523_vm8, %v476_v24, %v522_v37  ;;  %v624_v38 = vrot.slane %v623_v15, 2  ;;  %v636_v6 = vadd.f32 %v635_v12, %v2091_v18  ;;  %v649_v2 = vadd.f32 %v648_v57, %v566_v51 }
  0xcc   : > { %v600_v3 = vrot.slane %v599_v21, 1  ;;  %v613_v40 = vrot.slane %v612_v14, 1  ;;  %v661_v62 = vrot.slane %v568_v13, 4  ;;  %v690_v31 = vsel %vm513_vm3, %v588_v26, %v575_v35 }
  0xcd   : > { %v2146_v27 = vsel %vm521_vm7, %v2111_v33, %v1210_v30  ;;  %v625_v42 = vadd.f32 %v624_v38, %v623_v15  ;;  %v637_v52 = vrot.slane %v636_v6, 2  ;;  %v650_v46 = vrot.slane %v649_v2, 2  ;;  %v720_v30 = vld [vmem:[#allocation5 + $0x200] sm:$0xff] }
  0xce   : > { %v601_v19 = vadd.f32 %v600_v3, %v599_v21  ;;  %v614_v17 = vadd.f32 %v613_v40, %v612_v14  ;;  %v662_v25 = vadd.f32 %v661_v62, %v568_v13  ;;  %v730_v11 = vmul.f32 %v1430_v23, %v714_v20 }
  0xcf   : > { %v2151_v51 = vsel %vm525_vm9, %v489_v63, %v524_v41  ;;  %v626_v54 = vrot.slane %v625_v42, 1  ;;  %v638_v4 = vadd.f32 %v637_v52, %v636_v6  ;;  %v651_v59 = vadd.f32 %v650_v46, %v649_v2  ;;  %v878_v46 = vld [vmem:[#allocation5 + $0x30] sm:$0xff] }
  0xd0   : > { %v691_v18 = vsel %vm515_vm4, %v601_v19, %v690_v31  ;;  %v663_v22 = vrot.slane %v662_v25, 2  ;;  %v732_v39 = vmul.f32 %v1430_v23, %v716_v43  ;;  %v734_v7 = vmul.f32 %v1430_v23, %v718_v10 }
  0xd1   : > { %v692_v33 = vsel %vm517_vm5, %v614_v17, %v691_v18  ;;  %v627_v8 = vadd.f32 %v626_v54, %v625_v42  ;;  %v639_v48 = vrot.slane %v638_v4, 1  ;;  %v652_v60 = vrot.slane %v651_v59, 1  ;;  %v880_v18 = vld [vmem:[#allocation5 + $0x80] sm:$0xff] }
  0xd2   : > { %v740_v0 = vrot.slane %v1921_v55, 4  ;;  %v664_v53 = vadd.f32 %v663_v22, %v662_v25  ;;  %v753_v32 = vrot.slane %v1924_v61, 4  ;;  %v766_v29 = vrot.slane %v1946_v44, 4 }
  0xd3   : > { %v779_v47 = vrot.slane %v730_v11, 4  ;;  %v640_v56 = vadd.f32 %v639_v48, %v638_v4  ;;  %v693_v5 = vsel %vm519_vm6, %v627_v8, %v692_v33  ;;  %v736_v49 = vmul.f32 %v1430_v23, %v720_v30 }
  0xd4   : > { %v741_v24 = vadd.f32 %v740_v0, %v1921_v55  ;;  %v665_v37 = vrot.slane %v664_v53, 1  ;;  %v754_v13 = vadd.f32 %v753_v32, %v1924_v61  ;;  %v767_v58 = vadd.f32 %v766_v29, %v1946_v44  ;;  %v888_v32 = vld [vmem:[#allocation5 + $0x1c0] sm:$0xff] }
  0xd5   : > { %v780_v9 = vadd.f32 %v779_v47, %v730_v11  ;;  %v653_v21 = vadd.f32 %v652_v60, %v651_v59  ;;  %v792_v15 = vrot.slane %v732_v39, 4  ;;  %v805_v35 = vrot.slane %v734_v7, 4  ;;  %v882_v59 = vld [vmem:[#allocation5 + $0xd0] sm:$0xff]  ;;  %v358_v47 = vld [vmem:[%s2283_s4] sm:$0xff] }
  0xd6   : > { %v742_v36 = vrot.slane %v741_v24, 2  ;;  %v694_v12 = vsel %vm521_vm7, %v640_v56, %v693_v5  ;;  %v738_v57 = vmul.f32 %v1430_v23, %v722_v1  ;;  %v755_v63 = vrot.slane %v754_v13, 2 }
  0xd7   : > { %v768_v26 = vrot.slane %v767_v58, 2  ;;  %v781_v14 = vrot.slane %v780_v9, 2  ;;  %v793_v41 = vadd.f32 %v792_v15, %v732_v39  ;;  %v806_v38 = vadd.f32 %v805_v35, %v734_v7  ;;  %v884_v39 = vld [vmem:[#allocation5 + $0x120] sm:$0xff] }
  0xd8   : > { %v743_v3 = vadd.f32 %v742_v36, %v741_v24  ;;  %v666_v55 = vadd.f32 %v665_v37, %v664_v53  ;;  %v756_v6 = vadd.f32 %v755_v63, %v754_v13  ;;  %v818_v61 = vrot.slane %v736_v49, 4  ;;  %v1431_v7 = vld [vmem:[%s1748_s7 + $0x30] sm:$0xff] }
  0xd9   : > { %v769_v2 = vadd.f32 %v768_v26, %v767_v58  ;;  %v695_v44 = vsel %vm523_vm8, %v653_v21, %v694_v12  ;;  %v782_v19 = vadd.f32 %v781_v14, %v780_v9  ;;  %v794_v40 = vrot.slane %v793_v41, 2  ;;  %v886_v53 = vld [vmem:[#allocation5 + $0x170] sm:$0xff] }
  0xda   : > { %v744_v20 = vrot.slane %v743_v3, 1  ;;  %v757_v62 = vrot.slane %v756_v6, 1  ;;  %v807_v42 = vrot.slane %v806_v38, 2  ;;  %v819_v52 = vadd.f32 %v818_v61, %v736_v49  ;;  %v890_v63 = vld [vmem:[#allocation5 + $0x210] sm:$0xff] }
  0xdb   : > { %v770_v31 = vrot.slane %v769_v2, 1  ;;  %v783_v10 = vrot.slane %v782_v19, 1  ;;  %v795_v17 = vadd.f32 %v794_v40, %v793_v41  ;;  %v831_v25 = vrot.slane %v738_v57, 4 }
  0xdc   : > { %v745_v43 = vadd.f32 %v744_v20, %v743_v3  ;;  %v758_v23 = vadd.f32 %v757_v62, %v756_v6  ;;  %v808_v54 = vadd.f32 %v807_v42, %v806_v38  ;;  %v820_v4 = vrot.slane %v819_v52, 2  ;;  %v892_v38 = vld [vmem:[#allocation5 + $0x260] sm:$0xff]  ;;  %v287_v42 = vpop.permute.xlu0 %286 }
  0xdd   : > { %v771_v11 = vadd.f32 %v770_v31, %v769_v2  ;;  %v784_v22 = vadd.f32 %v783_v10, %v782_v19  ;;  %v796_v33 = vrot.slane %v795_v17, 1  ;;  %v832_v30 = vadd.f32 %v831_v25, %v738_v57 }
  0xde   : > { %v894_v8 = vmul.f32 %v1431_v7, %v878_v46  ;;  %v809_v48 = vrot.slane %v808_v54, 1  ;;  %v821_v60 = vadd.f32 %v820_v4, %v819_v52  ;;  %v860_v0 = vsel %vm513_vm3, %v758_v23, %v745_v43 }
  0xdf   : > { %v896_v29 = vmul.f32 %v1431_v7, %v880_v18  ;;  %v797_v56 = vadd.f32 %v796_v33, %v795_v17  ;;  %v833_v5 = vrot.slane %v832_v30, 2  ;;  %v861_v1 = vsel %vm515_vm4, %v771_v11, %v860_v0 }
  0xe0   : > { %v898_v49 = vmul.f32 %v1431_v7, %v882_v59  ;;  %v2171_v24 = vadd.f32 %v2097_v28, %v2093_v45  ;;  %v822_v37 = vrot.slane %v821_v60, 1  ;;  %v862_v13 = vsel %vm517_vm5, %v784_v22, %v861_v1 }
  0xe1   : > { %v900_v58 = vmul.f32 %v1431_v7, %v884_v39  ;;  %v1182_v9 = vrot.slane %v2119_v50, 1  ;;  %v810_v21 = vadd.f32 %v809_v48, %v808_v54  ;;  %v902_v36 = vmul.f32 %v1431_v7, %v886_v53 }
  0xe2   : > { %v904_v15 = vmul.f32 %v1431_v7, %v888_v32  ;;  %v2178_v35 = vsel %vm523_vm8, %v2138_v34, %v2146_v27  ;;  %v2181_v12 = vadd.f32 %v2151_v51, %v358_v47  ;;  %v2184_v45 = vsel %vm525_vm9, %v666_v55, %v695_v44 }
  0xe3   : > { %v863_v28 = vsel %vm519_vm6, %v797_v56, %v862_v13  ;;  %v834_v57 = vadd.f32 %v833_v5, %v832_v30  ;;  %v910_v26 = vrot.slane %v894_v8, 4  ;;  %v923_v3 = vrot.slane %v896_v29, 4  ;;  %v1048_v13 = vld [vmem:[#allocation5 + $0x40] sm:$0xff] }
  0xe4   : > { %v936_v14 = vrot.slane %v898_v49, 4  ;;  %v823_v41 = vadd.f32 %v822_v37, %v821_v60  ;;  %v949_v6 = vrot.slane %v900_v58, 4  ;;  %v962_v2 = vrot.slane %v902_v36, 4 }
  0xe5   : > { %v975_v61 = vrot.slane %v904_v15, 4  ;;  %v864_v27 = vsel %vm521_vm7, %v810_v21, %v863_v28  ;;  %v911_v51 = vadd.f32 %v910_v26, %v894_v8  ;;  %v924_v20 = vadd.f32 %v923_v3, %v896_v29  ;;  %v1052_v28 = vld [vmem:[#allocation5 + $0xe0] sm:$0xff] }
  0xe6   : > { %v937_v55 = vadd.f32 %v936_v14, %v898_v49  ;;  %v906_v19 = vmul.f32 %v1431_v7, %v890_v63  ;;  %v950_v40 = vadd.f32 %v949_v6, %v900_v58  ;;  %v963_v62 = vadd.f32 %v962_v2, %v902_v36  ;;  %v1050_v58 = vld [vmem:[#allocation5 + $0x90] sm:$0xff] }
  0xe7   : > { %v976_v31 = vadd.f32 %v975_v61, %v904_v15  ;;  %v835_v46 = vrot.slane %v834_v57, 1  ;;  %v908_v43 = vmul.f32 %v1431_v7, %v892_v38  ;;  %v912_v10 = vrot.slane %v911_v51, 2  ;;  %v1054_v14 = vld [vmem:[#allocation5 + $0x130] sm:$0xff] }
  0xe8   : > { %v925_v17 = vrot.slane %v924_v20, 2  ;;  %v865_v23 = vsel %vm523_vm8, %v823_v41, %v864_v27  ;;  %v938_v11 = vrot.slane %v937_v55, 2  ;;  %v951_v54 = vrot.slane %v950_v40, 2  ;;  %v1056_v41 = vld [vmem:[#allocation5 + $0x180] sm:$0xff]  ;;  %v1058_v38 = vld [vmem:[#allocation5 + $0x1d0] sm:$0xff] }
  0xe9   : > { %v913_v59 = vadd.f32 %v912_v10, %v911_v51  ;;  %v964_v33 = vrot.slane %v963_v62, 2  ;;  %v977_v48 = vrot.slane %v976_v31, 2  ;;  %v836_v21 = vadd.f32 %v835_v46, %v834_v57  ;;  %v1432_v61 = vld [vmem:[%s1748_s7 + $0x40] sm:$0xff] }
  0xea   : > { %v926_v22 = vadd.f32 %v925_v17, %v924_v20  ;;  %v939_v39 = vadd.f32 %v938_v11, %v937_v55  ;;  %v952_v8 = vadd.f32 %v951_v54, %v950_v40  ;;  %v988_v26 = vrot.slane %v906_v19, 4 }
  0xeb   : > { %v914_v0 = vrot.slane %v913_v59, 1  ;;  %v965_v7 = vadd.f32 %v964_v33, %v963_v62  ;;  %v978_v56 = vadd.f32 %v977_v48, %v976_v31  ;;  %v1001_v3 = vrot.slane %v908_v43, 4 }
  0xec   : > { %v927_v53 = vrot.slane %v926_v22, 1  ;;  %v940_v29 = vrot.slane %v939_v39, 1  ;;  %v953_v47 = vrot.slane %v952_v8, 1  ;;  %v1064_v27 = vmul.f32 %v1432_v61, %v1048_v13 }
  0xed   : > { %v915_v1 = vadd.f32 %v914_v0, %v913_v59  ;;  %v966_v37 = vrot.slane %v965_v7, 1  ;;  %v979_v63 = vrot.slane %v978_v56, 1  ;;  %v1066_v51 = vmul.f32 %v1432_v61, %v1050_v58 }
  0xee   : > { %v928_v49 = vadd.f32 %v927_v53, %v926_v22  ;;  %v941_v36 = vadd.f32 %v940_v29, %v939_v39  ;;  %v954_v15 = vadd.f32 %v953_v47, %v952_v8  ;;  %v989_v20 = vadd.f32 %v988_v26, %v906_v19  ;;  %v1062_v53 = vld [vmem:[#allocation5 + $0x270] sm:$0xff] }
  0xef   : > { %v967_v6 = vadd.f32 %v966_v37, %v965_v7  ;;  %v1002_v55 = vadd.f32 %v1001_v3, %v908_v43  ;;  %v1068_v40 = vmul.f32 %v1432_v61, %v1052_v28  ;;  %v1070_v31 = vmul.f32 %v1432_v61, %v1054_v14 }
  0xf0   : > { %v1030_v2 = vsel %vm513_vm3, %v928_v49, %v915_v1  ;;  %v2200_v46 = vadd.f32 %v1182_v9, %v2119_v50  ;;  %v2204_v10 = vadd.f32 %v2184_v45, %v2181_v12  ;;  %v980_v17 = vadd.f32 %v979_v63, %v978_v56 }
  0xf1   : > { %v1031_v57 = vsel %vm515_vm4, %v941_v36, %v1030_v2  ;;  %v990_v19 = vrot.slane %v989_v20, 2  ;;  %v1003_v43 = vrot.slane %v1002_v55, 2  ;;  %v1080_v11 = vrot.slane %v1064_v27, 4 }
  0xf2   : > { %v1032_v62 = vsel %vm517_vm5, %v954_v15, %v1031_v57  ;;  %v1093_v54 = vrot.slane %v1066_v51, 4  ;;  %v1106_v22 = vrot.slane %v1068_v40, 4  ;;  %v1119_v33 = vrot.slane %v1070_v31, 4 }
  0xf3   : > { %v991_v59 = vadd.f32 %v990_v19, %v989_v20  ;;  %v1081_v50 = vadd.f32 %v1080_v11, %v1064_v27  ;;  %v1004_v0 = vadd.f32 %v1003_v43, %v1002_v55 }
  0xf4   : > { %v1094_v9 = vadd.f32 %v1093_v54, %v1066_v51  ;;  %v1107_v8 = vadd.f32 %v1106_v22, %v1068_v40  ;;  %v1120_v48 = vadd.f32 %v1119_v33, %v1070_v31 }
  0xf5   : > { %v1082_v7 = vrot.slane %v1081_v50, 2  ;;  %v992_v56 = vrot.slane %v991_v59, 1  ;;  %v1005_v28 = vrot.slane %v1004_v0, 1 }
  0xf6   : > { %v1121_v58 = vrot.slane %v1120_v48, 2 }
  0xf7   : > { %v1083_v37 = vadd.f32 %v1082_v7, %v1081_v50  ;;  %v993_v3 = vadd.f32 %v992_v56, %v991_v59  ;;  %v1220_v59 = vsub.s32 0, %v2085_v16 }
  0xf9   : > { %v1084_v63 = vrot.slane %v1083_v37, 1 }
 0x136   : > { %v2187_v34 = vpop.f32.mrb[0].mxu0 }
 0x137   : > { %v2190_v44 = vpop.f32.mrb[1].mxu0 }
 0x138   : > { %v343_v52 = vpop.f32.mrb[2].mxu0 }
 0x139   : > { %v344_v25 = vadd.f32 %v343_v52, %v287_v42  ;;  %v345_v18 = vpop.f32.mrb[3].mxu0  ;;  %v1074_v52 = vmul.f32 %v1432_v61, %v1058_v38 }
 0x13a   : > { %v346_v4 = vadd.f32 %v345_v18, %v287_v42  ;;  %v1072_v42 = vmul.f32 %v1432_v61, %v1056_v41  ;;  %v1060_v18 = vld [vmem:[#allocation5 + $0x220] sm:$0xff]  ;;  %v1122_v41 = vadd.f32 %v1121_v58, %v1120_v48 }
 0x13b   : > { %v348_v30 = vsub.f32 0.0, %v344_v25  ;;  %v1033_v25 = vsel %vm519_vm6, %v967_v6, %v1032_v62  ;;  %v1145_v39 = vrot.slane %v1074_v52, 4  ;;  %v1076_v45 = vmul.f32 %v1432_v61, %v1060_v18 }
 0x13c   : > { %v349_v60 = vsub.f32 0.0, %v346_v4  ;;  %v2208_v4 = vsel %vm525_vm9, %v836_v21, %v865_v23  ;;  %v1034_v12 = vsel %vm521_vm7, %v980_v17, %v1033_v25  ;;  %v1078_v21 = vmul.f32 %v1432_v61, %v1062_v53 }
 0x13d   : > { %v350_v32 = vmul.f32 1.442695, %v348_v30  ;;  %v1132_v30 = vrot.slane %v1072_v42, 4  ;;  %v1146_v1 = vadd.f32 %v1145_v39, %v1074_v52  ;;  %v1085_v6 = vadd.f32 %v1084_v63, %v1083_v37 }
 0x13e   : > { %v352_v5 = vmul.f32 1.442695, %v349_v60  ;;  %v1158_v51 = vrot.slane %v1076_v45, 4  ;;  %v1123_v55 = vrot.slane %v1122_v41, 1  ;;  %v1171_v40 = vrot.slane %v1078_v21, 4 }
 0x13f   : > { %1421 = vpow2.f32 %v350_v32  ;;  %v1095_v32 = vrot.slane %v1094_v9, 2  ;;  %v1133_v29 = vadd.f32 %v1132_v30, %v1072_v42  ;;  %v1147_v27 = vrot.slane %v1146_v1, 2 }
 0x140   : > { %1423 = vpow2.f32 %v352_v5  ;;  %v1108_v5 = vrot.slane %v1107_v8, 2  ;;  %v1006_v62 = vadd.f32 %v1005_v28, %v1004_v0  ;;  %v1159_v31 = vadd.f32 %v1158_v51, %v1076_v45 }
 0x141   : > { %v1096_v13 = vadd.f32 %v1095_v32, %v1094_v9  ;;  %v1134_v15 = vrot.slane %v1133_v29, 2  ;;  %v1148_v61 = vadd.f32 %v1147_v27, %v1146_v1  ;;  %v1124_v52 = vadd.f32 %v1123_v55, %v1122_v41 }
 0x142   : > { %v1109_v36 = vadd.f32 %v1108_v5, %v1107_v8  ;;  %v1172_v19 = vadd.f32 %v1171_v40, %v1078_v21  ;;  %v1213_v25 = vsel %vm525_vm9, %v2200_v46, %v2178_v35  ;;  %v1035_v18 = vsel %vm523_vm8, %v993_v3, %v1034_v12  ;;  %v282_v8 = vpop.permute.xlu0 %281 }
 0x143   : > { %v1097_v26 = vrot.slane %v1096_v13, 1  ;;  %v1135_v38 = vadd.f32 %v1134_v15, %v1133_v29  ;;  %v1149_v11 = vrot.slane %v1148_v61, 1  ;;  %v1160_v54 = vrot.slane %v1159_v31, 2 }
 0x144   : > { %v1110_v14 = vrot.slane %v1109_v36, 1  ;;  %v1173_v22 = vrot.slane %v1172_v19, 2  ;;  %v876_v50 = vadd.f32 %v2208_v4, %v2204_v10  ;;  %v1217_v35 = vadd.f32 %v1213_v25, %v2171_v24 }
 0x145   : > { %v1098_v2 = vadd.f32 %v1097_v26, %v1096_v13  ;;  %v1136_v57 = vrot.slane %v1135_v38, 1  ;;  %v1150_v9 = vadd.f32 %v1149_v11, %v1148_v61  ;;  %v1161_v30 = vadd.f32 %v1160_v54, %v1159_v31 }
 0x146   : > { %v1111_v20 = vadd.f32 %v1110_v14, %v1109_v36  ;;  %v1036_v46 = vsel %vm525_vm9, %v1006_v62, %v1035_v18  ;;  %v1174_v12 = vadd.f32 %v1173_v22, %v1172_v19  ;;  %v340_v4 = vadd.f32 %v2187_v34, %v282_v8 }
 0x147   : > { %v1200_v42 = vsel %vm513_vm3, %v1098_v2, %v1085_v6  ;;  %v1137_v17 = vadd.f32 %v1136_v57, %v1135_v38  ;;  %v1046_v32 = vadd.f32 %v1036_v46, %v876_v50  ;;  %v342_v24 = vadd.f32 %v2190_v44, %v282_v8 }
 0x148   : > { %v1201_v43 = vsel %vm515_vm4, %v1111_v20, %v1200_v42  ;;  %v1175_v7 = vrot.slane %v1174_v12, 1 }
 0x149   : > { %v1422_v60 = vpop.eup %1421  ;;  %v1202_v33 = vsel %vm517_vm5, %v1124_v52, %v1201_v43 }
 0x14a   : > { %v1424_v23 = vpop.eup %1423  ;;  %v354_v47 = vadd.f32 1.0, %v1422_v60  ;;  %v1203_v39 = vsel %vm519_vm6, %v1137_v17, %v1202_v33  ;;  %v1162_v60 = vrot.slane %v1161_v30, 1  ;;  %v1176_v5 = vadd.f32 %v1175_v7, %v1174_v12 }
 0x14b   : > { %v355_v49 = vadd.f32 1.0, %v1424_v23  ;;  %v1204_v10 = vsel %vm521_vm7, %v1150_v9, %v1203_v39 }
 0x14c   : > { %1425 = vrcp.f32 %v354_v47  ;;  %v1163_v29 = vadd.f32 %v1162_v60, %v1161_v30 }
 0x14d   : > { %1427 = vrcp.f32 %v355_v49 }
 0x14e   : > { %v1205_v49 = vsel %vm523_vm8, %v1163_v29, %v1204_v10 }
 0x14f   : > { %v1206_v13 = vsel %vm525_vm9, %v1176_v5, %v1205_v49 }
 0x150   : > { %v1216_v21 = vadd.f32 %v1206_v13, %v1046_v32 }
 0x156   : > { %v1426_v45 = vpop.eup %1425 }
 0x157   : > { %v1428_v48 = vpop.eup %1427  ;;  %v1228_v16 = vsub.f32 1.0, %v1426_v45  ;;  %v1221_v1 = vrot.slane %v1426_v45, %v1220_v59 }
 0x158   : > { %v1225_v0 = vrot.slane %v1428_v48, %v1220_v59  ;;  %v1229_v53 = vsub.f32 1.0, %v1428_v48 }
 0x159   : > { %v1233_v23 = vrot.slane %v1228_v16, %v1220_v59  ;;  %v1226_v34 = vmul.f32 %v1221_v1, %v1216_v21 }
 0x15a   : > { %v1227_v47 = vmul.f32 %v1225_v0, %v1217_v35  ;;  %v1237_v56 = vrot.slane %v1229_v53, %v1220_v59 }
 0x15b   : > { %v1238_v37 = vmul.f32 %v1233_v23, %v340_v4 }
 0x15c   : > { %v1239_v58 = vmul.f32 %v1237_v56, %v342_v24 }
 0x15d   : > { %v1240_v44 = vadd.f32 %v1238_v37, %v1226_v34 }
 0x15e   : > { %v1241_v36 = vadd.f32 %v1239_v58, %v1227_v47 }
 0x15f   : > { %1242 = vst [vmem:[%s257_s10] sm:$0xff] %v1240_v44 }
 0x160   : > { %1243 = vst.msk [vmem:[%s257_s10 + $0x8] sm:$0xff] %vm398_vm2, %v1241_v36 }
 0x161   : > { %1504 = shalt.err (!%p1501_p7)
}
 0x162   : > { %s1505_s27 = scalar_lea.hbm %s2235_s26, 256  ;;  %s1509_s11 = scalar_lea.hbm %s2284_s5, 512 }
 0x163   : > { %p1506_p9 = scmp.ne.s32.totalorder %s2235_s26, %s1505_s27  ;;  %p1510_p5 = scmp.lt.u32.totalorder %s2235_s26, %s2284_s5 }
 0x164   : > { %p1511_p13 = scmp.lt.u32.totalorder %s1509_s11, %s1505_s27  ;;  %p1513_p4 = scmp.lt.u32.totalorder %s1505_s27, %s2235_s26 }
 0x165   : > { %p1507_p1 = pnand %p1506_p9, %p1693_p12 }
 0x166   : > { %p1512_p2 = por %p1511_p13, %p1510_p5 }
 0x167   : > { %p1508_p0 = pneg %p1507_p1 }
 0x168   : > { %p1514_p6 = por %p1513_p4, %p1512_p2 }
 0x16a   : > { %p1515_p8 = pnand %p1514_p6, %p1508_p0 }
 0x16c   : > { %1518 = shalt.err (!%p1515_p8)
}
 0x16d   : > { %1365 = dma.vmem_to_hbm [thread:$0]  (%p1693_p12), %s2237_s28, 256, %s2235_s26, %s1245_s17  }
 0x16e PF: > { %s1271_s23 = sand.u32 1, %s1549_s18   ;;  %p2307_p10 = scmp.ne.s32.totalorder %s2290_s25, 0 }
 0x16f   : > { %p2308_p11 = scmp.ge.s32.totalorder %s1561_s21, 2  ;;  %s1272_s10 = scalar_lea.sflag [#allocation4], %s1271_s23 }
 0x171   : > { %p1376_p3 = pnand %p2308_p11, %p2307_p10 }
 0x173   : > { %1544 = dma.done.wait (!%p1376_p3), %s1272_s10, 256  }
 0x174   : > { %1546 = vsyncadd (!%p1376_p3), %s1272_s10, 4294967040  ;;  %p19_p7 = scmp.ge.s32.totalorder %s1655_s30, 4   ;;  %s2309_s18 = smov %s1553_s19 }
 0x175   : > { %s2310_s19 = smov %s1557_s20  ;;  %s2311_s20 = smov %s1689_s8 }
 0x176   : > { %s2312_s21 = smov %s1655_s30  ;;  %21 = sbr.rel (!%p19_p7) target bundleno = 6 (0x6), region = 89 }
 0x17d   :  { %1277 = vsyncpa [#allocation3], 1 }
 0x17e   :  { %1279 = vsyncpa [#allocation3 + $0x1], 1 }
 0x17f   :  { %1280 = vsyncpa [#allocation6], 1 }
 0x180   :  { %1281 = vsyncpa [#allocation4], 1 }
 0x181   :  { %1283 = vsyncpa [#allocation4 + $0x1], 1 }

</bundles_post_ra>
